<compile_context>
chip_gen: v5e
topology: v5e:2x2
jax: 0.10.0
libtpu: 0.0.40
codegen_flags: <defaults>
</compile_context>

<pallas_src>
import math

import jax
import jax.numpy as jnp
import numpy as np
from jax.experimental import pallas as pl
from jax.experimental.pallas import tpu as pltpu


def qk_attention_kernel(enc_ref, dec_ref, w_ref, b_ref, out_ref):
    """Fused QK attention.

    enc_ref: (L, H)   encoder hidden states
    dec_ref: (1, H)   decoder hidden state
    w_ref:   (H, 2H)  packed [W_q^T | W_k^T]
    b_ref:   (1, 2H)  packed [b_q | b_k]
    out_ref: (1, H)   attention-applied context
    """
    H = dec_ref.shape[-1]
    inv_sqrt_h = jnp.float32(1.0 / math.sqrt(H))

    enc = enc_ref[...]                                                      # (L, H)

    # Query / key projections.  Slab slices are static and lane-aligned (H % 128 == 0).
    q = jnp.dot(dec_ref[...], w_ref[:, 0:H],
                preferred_element_type=jnp.float32) + b_ref[:, 0:H]         # (1, H)
    keys = jnp.dot(enc, w_ref[:, H:2 * H],
                   preferred_element_type=jnp.float32) + b_ref[:, H:2 * H]  # (L, H)

    # Lane-dense scores: (1, L) = q @ keys^T, scaled by 1/sqrt(H).
    scores = jax.lax.dot_general(
        q, keys, (((1,), (1,)), ((), ())),
        preferred_element_type=jnp.float32) * inv_sqrt_h                    # (1, L)

    # Softmax over encoder positions (lane axis == torch softmax dim=0 on (L, 1)).
    m = jnp.max(scores, axis=-1, keepdims=True)
    e = jnp.exp(scores - m)
    attn = e / jnp.sum(e, axis=-1, keepdims=True)                           # (1, L)

    # Context: (1, H) = attn @ enc  (MXU dot; replaces lane-sparse weighted sum).
    out_ref[...] = jnp.dot(attn, enc, preferred_element_type=jnp.float32)


def pack_params(params):
    """Pack the two linear layers into one weight slab and one bias slab (done once)."""
    w_slab = jnp.concatenate([params["w_q_t"], params["w_k_t"]], axis=1)    # (H, 2H)
    b_slab = jnp.concatenate([params["b_q"], params["b_k"]], axis=1)        # (1, 2H)
    return w_slab, b_slab


def qk_attention_forward(encoder_hiddens, decoder_hidden, w_slab, b_slab):
    """encoder_hiddens: (L, 1, H), decoder_hidden: (1, 1, H) -> attn_applied (1, 1, H)."""
    L, _, H = encoder_hiddens.shape
    enc = encoder_hiddens.reshape(L, H)
    dec = decoder_hidden.reshape(1, H)

    out = pl.pallas_call(
        qk_attention_kernel,
        out_shape=jax.ShapeDtypeStruct((1, H), jnp.float32),
        grid=(1,),
        in_specs=[
            pl.BlockSpec((L, H), lambda i: (0, 0)),          # encoder hiddens
            pl.BlockSpec((1, H), lambda i: (0, 0)),          # decoder hidden
            pl.BlockSpec((H, 2 * H), lambda i: (0, 0)),      # packed weights
            pl.BlockSpec((1, 2 * H), lambda i: (0, 0)),      # packed biases
        ],
        out_specs=pl.BlockSpec((1, H), lambda i: (0, 0)),
        compiler_params=pltpu.CompilerParams(
            dimension_semantics=("arbitrary",)),
    )(enc, dec, w_slab, b_slab)
    return out.reshape(1, 1, H)


def reference_forward(encoder_hiddens, decoder_hidden, params):
    """Pure-JAX reference mirroring the PyTorch QKAttention forward."""
    L, _, H = encoder_hiddens.shape
    enc = encoder_hiddens.reshape(L, H)
    dec = decoder_hidden.reshape(1, H)
    query = dec @ params["w_q_t"] + params["b_q"]                 # (1, H)
    keys = enc @ params["w_k_t"] + params["b_k"]                  # (L, H)
    attn_score = (keys @ query.T) / jnp.sqrt(jnp.float32(H))      # (L, 1)
    attn_weights = jax.nn.softmax(attn_score, axis=0)             # softmax over dim 0
    attn_applied = attn_weights.T @ enc                           # (1, H)
    return attn_applied.reshape(1, 1, H)


def init_params(key, hidden_size):
    H = hidden_size
    ks = jax.random.split(key, 4)
    s = 0.05
    return {
        "w_q_t": jax.random.normal(ks[0], (H, H), jnp.float32) * s,
        "b_q":   jax.random.normal(ks[1], (1, H), jnp.float32) * s,
        "w_k_t": jax.random.normal(ks[2], (H, H), jnp.float32) * s,
        "b_k":   jax.random.normal(ks[3], (1, H), jnp.float32) * s,
    }


if __name__ == "__main__":
    H = 512   # hidden_size (hardcoded to 512 in the PyTorch module)
    L = 8     # number of encoder hidden states

    key = jax.random.PRNGKey(0)
    kp, ke, kd = jax.random.split(key, 3)
    params = init_params(kp, H)

    encoder_hiddens = jax.random.normal(ke, (L, 1, H), jnp.float32)   # (L, 1, H)
    decoder_hidden = jax.random.normal(kd, (1, 1, H), jnp.float32)    # (1, 1, H)

    # Pack the two linear layers once (module-init-time work, not per-call).
    w_slab, b_slab = pack_params(params)

    attn_applied = qk_attention_forward(encoder_hiddens, decoder_hidden, w_slab, b_slab)
    jax.block_until_ready(attn_applied)

    ref = reference_forward(encoder_hiddens, decoder_hidden, params)
    np.testing.assert_allclose(np.asarray(attn_applied), np.asarray(ref),
                               rtol=1e-4, atol=1e-4)

    print("KERNEL_OK")
</pallas_src>

<mosaic_0001>
module attributes {stable_mosaic.version = 11 : i64} {
  func.func @qk_attention_kernel(%arg0: i32, %arg1: memref<8x512xf32, #tpu.memory_space<vmem>>, %arg2: memref<1x512xf32, #tpu.memory_space<vmem>>, %arg3: memref<512x1024xf32, #tpu.memory_space<vmem>>, %arg4: memref<1x1024xf32, #tpu.memory_space<vmem>>, %arg5: memref<1x512xf32, #tpu.memory_space<vmem>>) attributes {dimension_semantics = [#tpu.dimension_semantics<arbitrary>], iteration_bounds = array<i64: 1>, scalar_prefetch = 0 : i64, scratch_operands = 0 : i64, tpu.core_type = #tpu.core_type<tc>, window_params = [{pipeline_mode = #tpu.pipeline_mode<synchronous>, transform_indices = @transform_0, window_bounds = array<i64: 8, 512>}, {pipeline_mode = #tpu.pipeline_mode<synchronous>, transform_indices = @transform_1, window_bounds = array<i64: 1, 512>}, {pipeline_mode = #tpu.pipeline_mode<synchronous>, transform_indices = @transform_2, window_bounds = array<i64: 512, 1024>}, {pipeline_mode = #tpu.pipeline_mode<synchronous>, transform_indices = @transform_3, window_bounds = array<i64: 1, 1024>}, {pipeline_mode = #tpu.pipeline_mode<synchronous>, transform_indices = @transform_4, window_bounds = array<i64: 1, 512>}]} {
    %c0 = arith.constant 0 : index
    %c0_0 = arith.constant 0 : index
    %0 = vector.load %arg1[%c0, %c0_0] : memref<8x512xf32, #tpu.memory_space<vmem>>, vector<8x512xf32>
    %c0_1 = arith.constant 0 : index
    %c0_2 = arith.constant 0 : index
    %1 = vector.load %arg2[%c0_1, %c0_2] : memref<1x512xf32, #tpu.memory_space<vmem>>, vector<1x512xf32>
    %c0_3 = arith.constant 0 : index
    %c0_4 = arith.constant 0 : index
    %2 = vector.load %arg3[%c0_3, %c0_4] : memref<512x1024xf32, #tpu.memory_space<vmem>>, vector<512x512xf32>
    %cst = arith.constant dense<0.000000e+00> : vector<1x512xf32>
    %3 = tpu.matmul %1, %2, %cst {dimension_numbers = #tpu.dot_dimension_numbers<[1], [0], [0], [1], [0, 0, 1, 1], [], []>} : vector<1x512xf32>, vector<512x512xf32>, vector<1x512xf32> -> vector<1x512xf32>
    %c0_5 = arith.constant 0 : index
    %c0_6 = arith.constant 0 : index
    %4 = vector.load %arg4[%c0_5, %c0_6] : memref<1x1024xf32, #tpu.memory_space<vmem>>, vector<1x512xf32>
    %5 = arith.addf %3, %4 : vector<1x512xf32>
    %c0_7 = arith.constant 0 : index
    %c512 = arith.constant 512 : index
    %6 = vector.load %arg3[%c0_7, %c512] : memref<512x1024xf32, #tpu.memory_space<vmem>>, vector<512x512xf32>
    %cst_8 = arith.constant dense<0.000000e+00> : vector<8x512xf32>
    %7 = tpu.matmul %0, %6, %cst_8 {dimension_numbers = #tpu.dot_dimension_numbers<[1], [0], [0], [1], [0, 0, 1, 1], [], []>} : vector<8x512xf32>, vector<512x512xf32>, vector<8x512xf32> -> vector<8x512xf32>
    %c0_9 = arith.constant 0 : index
    %c512_10 = arith.constant 512 : index
    %8 = vector.load %arg4[%c0_9, %c512_10] : memref<1x1024xf32, #tpu.memory_space<vmem>>, vector<1x512xf32>
    %9 = vector.broadcast %8 : vector<1x512xf32> to vector<8x512xf32>
    %10 = arith.addf %7, %9 : vector<8x512xf32>
    %cst_11 = arith.constant dense<0.000000e+00> : vector<1x8xf32>
    %11 = tpu.matmul %5, %10, %cst_11 {dimension_numbers = #tpu.dot_dimension_numbers<[1], [1], [0], [0], [0, 0, 1, 0], [], []>} : vector<1x512xf32>, vector<8x512xf32>, vector<1x8xf32> -> vector<1x8xf32>
    %cst_12 = arith.constant 0.0441941731 : f32
    %12 = vector.broadcast %cst_12 : f32 to vector<1x8xf32>
    %13 = arith.mulf %11, %12 : vector<1x8xf32>
    %cst_13 = arith.constant dense<0xFF800000> : vector<1xf32>
    %14 = vector.multi_reduction <maximumf>, %13, %cst_13 [1] : vector<1x8xf32> to vector<1xf32>
    %15 = vector.shape_cast %14 : vector<1xf32> to vector<1x1xf32>
    %16 = vector.broadcast %15 : vector<1x1xf32> to vector<1x8xf32>
    %17 = arith.subf %13, %16 : vector<1x8xf32>
    %18 = math.exp %17 : vector<1x8xf32>
    %cst_14 = arith.constant dense<0.000000e+00> : vector<1xf32>
    %19 = vector.multi_reduction <add>, %18, %cst_14 [1] : vector<1x8xf32> to vector<1xf32>
    %20 = vector.shape_cast %19 : vector<1xf32> to vector<1x1xf32>
    %21 = vector.broadcast %20 : vector<1x1xf32> to vector<1x8xf32>
    %22 = arith.divf %18, %21 : vector<1x8xf32>
    %cst_15 = arith.constant dense<0.000000e+00> : vector<1x512xf32>
    %23 = tpu.matmul %22, %0, %cst_15 {dimension_numbers = #tpu.dot_dimension_numbers<[1], [0], [0], [1], [0, 0, 1, 1], [], []>} : vector<1x8xf32>, vector<8x512xf32>, vector<1x512xf32> -> vector<1x512xf32>
    %c0_16 = arith.constant 0 : index
    %c0_17 = arith.constant 0 : index
    %24 = vector.load %arg5[%c0_16, %c0_17] : memref<1x512xf32, #tpu.memory_space<vmem>>, vector<1x512xf32>
    tpu.vector_store %arg5[%c0_16, %c0_17], %23 {strides = array<i32>} : memref<1x512xf32, #tpu.memory_space<vmem>>, vector<1x512xf32>,
    return
  }
  func.func @transform_0(%arg0: i32) -> (i32, i32) {
    %c0_i32 = arith.constant 0 : i32
    %c0_i32_0 = arith.constant 0 : i32
    %c0_i32_1 = arith.constant 0 : i32
    return %c0_i32, %c0_i32_0 : i32, i32
  }
  func.func @transform_1(%arg0: i32) -> (i32, i32) {
    %c0_i32 = arith.constant 0 : i32
    %c0_i32_0 = arith.constant 0 : i32
    %c0_i32_1 = arith.constant 0 : i32
    return %c0_i32, %c0_i32_0 : i32, i32
  }
  func.func @transform_2(%arg0: i32) -> (i32, i32) {
    %c0_i32 = arith.constant 0 : i32
    %c0_i32_0 = arith.constant 0 : i32
    %c0_i32_1 = arith.constant 0 : i32
    return %c0_i32, %c0_i32_0 : i32, i32
  }
  func.func @transform_3(%arg0: i32) -> (i32, i32) {
    %c0_i32 = arith.constant 0 : i32
    %c0_i32_0 = arith.constant 0 : i32
    %c0_i32_1 = arith.constant 0 : i32
    return %c0_i32, %c0_i32_0 : i32, i32
  }
  func.func @transform_4(%arg0: i32) -> (i32, i32) {
    %c0_i32 = arith.constant 0 : i32
    %c0_i32_0 = arith.constant 0 : i32
    %c0_i32_1 = arith.constant 0 : i32
    return %c0_i32, %c0_i32_0 : i32, i32
  }
}

</mosaic_0001>

<bundles_post_ra>
// kernel: tpu_custom_call.1
= control target key start
LH: loop header
LB: loop body
LE: loop exit
PB: predicated region body
PF: predicated region fallthrough
CT: control target
= control target key end

     0   :  { %9 = vsyncpa [#allocation3], 0  ;;  %s1764_s0 = inlined_call_operand.hbm [shape: f32[8,512], index: 0, kind: input, shape index: {}]   ;;  %s1765_s1 = inlined_call_operand.hbm [shape: f32[1,512], index: 1, kind: input, shape index: {}]   ;;  %s1766_s2 = inlined_call_operand.hbm [shape: f32[512,1024], index: 2, kind: input, shape index: {}]   ;;  %s1767_s3 = inlined_call_operand.hbm [shape: f32[1,1024], index: 3, kind: input, shape index: {}]   ;;  %s1768_s4 = inlined_call_operand.hbm [shape: f32[1,512], index: 4, kind: output, shape index: {}]  }
   0x1   :  { %10 = vsyncpa [#allocation6], 0 }
   0x2   :  { %11 = vsyncpa [#allocation9], 0  ;;  %s29_s17 = sshll.u32 %s1765_s1, 4  ;;  %s30_s17 = int_to_ptr.hbm [resolvable:$true] %s29_s17 }
   0x3   :  { %12 = vsyncpa [#allocation4], 0  ;;  %s1632_s18 = smov [#allocation5]   ;;  %s18_s22 = sshll.u32 %s1764_s0, 4  ;;  %s19_s22 = int_to_ptr.hbm [resolvable:$true] %s18_s22 }
   0x4   :  { %s31_s19 = sshll.u32 %s1632_s18, 4  ;;  %s1633_s23 = smov [#allocation2]   ;;  %s32_s19 = int_to_ptr.vmem [resolvable:$true] %s31_s19 }
   0x5   :  { %34 = dma.hbm_to_vmem [thread:$0]  %s30_s17, 64, %s32_s19, [#allocation6]  }
   0x6   :  { %s20_s24 = sshll.u32 %s1633_s23, 4  ;;  %s39_s27 = sshll.u32 %s1766_s2, 4  ;;  %s21_s24 = int_to_ptr.vmem [resolvable:$true] %s20_s24  ;;  %s40_s27 = int_to_ptr.hbm [resolvable:$true] %s39_s27 }
   0x7   :  { %23 = dma.hbm_to_vmem [thread:$0]  %s19_s22, 512, %s21_s24, [#allocation3]  }
   0x8   :  { %s1634_s1 = smov [#allocation7]   ;;  %s53_s5 = sshll.u32 %s1767_s3, 4  ;;  %s54_s5 = int_to_ptr.hbm [resolvable:$true] %s53_s5 }
   0x9   :  { %s41_s28 = sshll.u32 %s1634_s1, 4  ;;  %s1635_s6 = smov 1024   ;;  %s42_s28 = int_to_ptr.vmem [resolvable:$true] %s41_s28 }
   0xa   :  { %s1636_s0 = smov 64   ;;  %s1637_s7 = smov [#allocation8]  }
   0xb   :  { %47 = dma.hbm_to_vmem [thread:$0]  %s40_s27, 65536, %s42_s28, [#allocation6], %s1635_s6, %s1635_s6, %s1636_s0  }
   0xc   :  { %s55_s8 = sshll.u32 %s1637_s7, 4  ;;  %s56_s8 = int_to_ptr.vmem [resolvable:$true] %s55_s8 }
   0xd   :  { %58 = dma.hbm_to_vmem [thread:$0]  %s54_s5, 128, %s56_s8, [#allocation9]  }
   0xe   :  { %1624 = dma.done.wait [#allocation3], 512  }
   0xf   :  { %1625 = vsyncadd [#allocation3], 4294966784 }
  0x10   :  { %1626 = dma.done.wait [#allocation6], 65600  }
  0x11   :  { %1627 = vsyncadd [#allocation6], 4294901696 }
  0x12   :  { %1628 = dma.done.wait [#allocation9], 128  }
  0x13   :  { %1629 = vsyncadd [#allocation9], 4294967168  ;;  %v268_v0 = vld [vmem:[#allocation7 + $0xbc0] sm:$0xff]  ;;  %v269_v62 = vld [vmem:[#allocation7 + $0xbc8] sm:$0xff]  ;;  %vm1342_vm0 = vcmask 57344   ;;  %vm1367_vm5 = vcmask 64512  }
  0x14   :  { %v140_v1 = vld [vmem:[#allocation7 + $0x3c0] sm:$0xff]  ;;  %395 = vmatpush.msra.mxu2 %v268_v0  ;;  %v141_v0 = vld [vmem:[#allocation7 + $0x3c8] sm:$0xff]  ;;  %vm1458_vm6 = vcmask 1040384   ;;  %vm1460_vm7 = vcmask 1042434   ;;  %s1638_s2 = smov [#allocation10]   ;;  %s1477_s11 = sshll.u32 %s1768_s4, 4  ;;  %s1478_s11 = int_to_ptr.hbm [resolvable:$true] %s1477_s11 }
  0x15   :  { %v264_v2 = vld [vmem:[#allocation7 + $0xb80] sm:$0xff]  ;;  %355 = vmatpush.msra.mxu0 %v140_v1  ;;  %v333_v1 = vld [vmem:[#allocation7 + $0xfc8] sm:$0xff]  ;;  %s1475_s3 = sshll.u32 %s1638_s2, 4  ;;  %vm1462_vm8 = vcmask 1041408   ;;  %s1476_s3 = int_to_ptr.vmem [resolvable:$true] %s1475_s3 }
  0x16   :  { %v332_v3 = vld [vmem:[#allocation7 + $0xfc0] sm:$0xff]  ;;  %396 = vmatpush.msra.mxu2 %v264_v2  ;;  %v265_v2 = vld [vmem:[#allocation7 + $0xb88] sm:$0xff] }
  0x17   :  { %v136_v4 = vld [vmem:[#allocation7 + $0x380] sm:$0xff]  ;;  %415 = vmatpush.msra.mxu3 %v332_v3 }
  0x18   :  { %v204_v5 = vld [vmem:[#allocation7 + $0x7c0] sm:$0xff]  ;;  %356 = vmatpush.msra.mxu0 %v136_v4  ;;  %v137_v4 = vld [vmem:[#allocation7 + $0x388] sm:$0xff] }
  0x19   :  { %375 = vmatpush.msra.mxu1 %v204_v5  ;;  %v260_v6 = vld [vmem:[#allocation7 + $0xb40] sm:$0xff]  ;;  %v205_v5 = vld [vmem:[#allocation7 + $0x7c8] sm:$0xff] }
  0x1a   :  { %v328_v7 = vld [vmem:[#allocation7 + $0xf80] sm:$0xff]  ;;  %397 = vmatpush.msra.mxu2 %v260_v6  ;;  %v261_v6 = vld [vmem:[#allocation7 + $0xb48] sm:$0xff] }
  0x1b   :  { %v132_v8 = vld [vmem:[#allocation7 + $0x340] sm:$0xff]  ;;  %416 = vmatpush.msra.mxu3 %v328_v7  ;;  %v329_v7 = vld [vmem:[#allocation7 + $0xf88] sm:$0xff] }
  0x1c   :  { %v200_v9 = vld [vmem:[#allocation7 + $0x780] sm:$0xff]  ;;  %357 = vmatpush.msra.mxu0 %v132_v8  ;;  %v133_v8 = vld [vmem:[#allocation7 + $0x348] sm:$0xff] }
  0x1d   :  { %v324_v10 = vld [vmem:[#allocation7 + $0xf40] sm:$0xff]  ;;  %376 = vmatpush.msra.mxu1 %v200_v9  ;;  %v201_v9 = vld [vmem:[#allocation7 + $0x788] sm:$0xff] }
  0x1e   :  { %v256_v11 = vld [vmem:[#allocation7 + $0xb00] sm:$0xff]  ;;  %417 = vmatpush.msra.mxu3 %v324_v10  ;;  %v257_v10 = vld [vmem:[#allocation7 + $0xb08] sm:$0xff] }
  0x1f   :  { %v128_v12 = vld [vmem:[#allocation7 + $0x300] sm:$0xff]  ;;  %398 = vmatpush.msra.mxu2 %v256_v11  ;;  %v325_v11 = vld [vmem:[#allocation7 + $0xf48] sm:$0xff] }
  0x20   :  { %v196_v13 = vld [vmem:[#allocation7 + $0x740] sm:$0xff]  ;;  %358 = vmatpush.msra.mxu0 %v128_v12  ;;  %v129_v12 = vld [vmem:[#allocation7 + $0x308] sm:$0xff] }
  0x21   :  { %v320_v14 = vld [vmem:[#allocation7 + $0xf00] sm:$0xff]  ;;  %377 = vmatpush.msra.mxu1 %v196_v13  ;;  %v197_v13 = vld [vmem:[#allocation7 + $0x748] sm:$0xff] }
  0x22   :  { %v192_v15 = vld [vmem:[#allocation7 + $0x700] sm:$0xff]  ;;  %418 = vmatpush.msra.mxu3 %v320_v14  ;;  %v253_v14 = vld [vmem:[#allocation7 + $0xac8] sm:$0xff] }
  0x23   :  { %v252_v16 = vld [vmem:[#allocation7 + $0xac0] sm:$0xff]  ;;  %378 = vmatpush.msra.mxu1 %v192_v15  ;;  %v321_v15 = vld [vmem:[#allocation7 + $0xf08] sm:$0xff] }
  0x24   :  { %v124_v17 = vld [vmem:[#allocation7 + $0x2c0] sm:$0xff]  ;;  %399 = vmatpush.msra.mxu2 %v252_v16  ;;  %v125_v16 = vld [vmem:[#allocation7 + $0x2c8] sm:$0xff] }
  0x25   :  { %v316_v18 = vld [vmem:[#allocation7 + $0xec0] sm:$0xff]  ;;  %359 = vmatpush.msra.mxu0 %v124_v17  ;;  %v193_v17 = vld [vmem:[#allocation7 + $0x708] sm:$0xff] }
  0x26   :  { %v188_v19 = vld [vmem:[#allocation7 + $0x6c0] sm:$0xff]  ;;  %419 = vmatpush.msra.mxu3 %v316_v18  ;;  %v249_v18 = vld [vmem:[#allocation7 + $0xa88] sm:$0xff] }
  0x27   :  { %v248_v20 = vld [vmem:[#allocation7 + $0xa80] sm:$0xff]  ;;  %379 = vmatpush.msra.mxu1 %v188_v19  ;;  %v317_v19 = vld [vmem:[#allocation7 + $0xec8] sm:$0xff] }
  0x28   :  { %v120_v21 = vld [vmem:[#allocation7 + $0x280] sm:$0xff]  ;;  %400 = vmatpush.msra.mxu2 %v248_v20  ;;  %v121_v20 = vld [vmem:[#allocation7 + $0x288] sm:$0xff] }
  0x29   :  { %v312_v22 = vld [vmem:[#allocation7 + $0xe80] sm:$0xff]  ;;  %360 = vmatpush.msra.mxu0 %v120_v21  ;;  %v189_v21 = vld [vmem:[#allocation7 + $0x6c8] sm:$0xff] }
  0x2a   :  { %v184_v23 = vld [vmem:[#allocation7 + $0x680] sm:$0xff]  ;;  %420 = vmatpush.msra.mxu3 %v312_v22  ;;  %v245_v22 = vld [vmem:[#allocation7 + $0xa48] sm:$0xff] }
  0x2b   :  { %v244_v24 = vld [vmem:[#allocation7 + $0xa40] sm:$0xff]  ;;  %380 = vmatpush.msra.mxu1 %v184_v23  ;;  %v313_v23 = vld [vmem:[#allocation7 + $0xe88] sm:$0xff] }
  0x2c   :  { %v116_v25 = vld [vmem:[#allocation7 + $0x240] sm:$0xff]  ;;  %401 = vmatpush.msra.mxu2 %v244_v24  ;;  %v117_v24 = vld [vmem:[#allocation7 + $0x248] sm:$0xff] }
  0x2d   :  { %v308_v26 = vld [vmem:[#allocation7 + $0xe40] sm:$0xff]  ;;  %361 = vmatpush.msra.mxu0 %v116_v25  ;;  %v185_v25 = vld [vmem:[#allocation7 + $0x688] sm:$0xff] }
  0x2e   :  { %v180_v27 = vld [vmem:[#allocation7 + $0x640] sm:$0xff]  ;;  %421 = vmatpush.msra.mxu3 %v308_v26  ;;  %v241_v26 = vld [vmem:[#allocation7 + $0xa08] sm:$0xff] }
  0x2f   :  { %v240_v28 = vld [vmem:[#allocation7 + $0xa00] sm:$0xff]  ;;  %381 = vmatpush.msra.mxu1 %v180_v27  ;;  %v309_v27 = vld [vmem:[#allocation7 + $0xe48] sm:$0xff] }
  0x30   :  { %v112_v29 = vld [vmem:[#allocation7 + $0x200] sm:$0xff]  ;;  %402 = vmatpush.msra.mxu2 %v240_v28  ;;  %v113_v28 = vld [vmem:[#allocation7 + $0x208] sm:$0xff] }
  0x31   :  { %v304_v30 = vld [vmem:[#allocation7 + $0xe00] sm:$0xff]  ;;  %362 = vmatpush.msra.mxu0 %v112_v29  ;;  %v181_v29 = vld [vmem:[#allocation7 + $0x648] sm:$0xff] }
  0x32   :  { %v176_v31 = vld [vmem:[#allocation7 + $0x600] sm:$0xff]  ;;  %422 = vmatpush.msra.mxu3 %v304_v30  ;;  %v237_v30 = vld [vmem:[#allocation7 + $0x9c8] sm:$0xff] }
  0x33   :  { %v236_v32 = vld [vmem:[#allocation7 + $0x9c0] sm:$0xff]  ;;  %382 = vmatpush.msra.mxu1 %v176_v31  ;;  %v305_v31 = vld [vmem:[#allocation7 + $0xe08] sm:$0xff] }
  0x34   :  { %v108_v33 = vld [vmem:[#allocation7 + $0x1c0] sm:$0xff]  ;;  %403 = vmatpush.msra.mxu2 %v236_v32  ;;  %v109_v32 = vld [vmem:[#allocation7 + $0x1c8] sm:$0xff] }
  0x35   :  { %v300_v34 = vld [vmem:[#allocation7 + $0xdc0] sm:$0xff]  ;;  %363 = vmatpush.msra.mxu0 %v108_v33  ;;  %v177_v33 = vld [vmem:[#allocation7 + $0x608] sm:$0xff] }
  0x36   :  { %v172_v35 = vld [vmem:[#allocation7 + $0x5c0] sm:$0xff]  ;;  %423 = vmatpush.msra.mxu3 %v300_v34  ;;  %v233_v34 = vld [vmem:[#allocation7 + $0x988] sm:$0xff] }
  0x37   :  { %v232_v36 = vld [vmem:[#allocation7 + $0x980] sm:$0xff]  ;;  %383 = vmatpush.msra.mxu1 %v172_v35  ;;  %v301_v35 = vld [vmem:[#allocation7 + $0xdc8] sm:$0xff] }
  0x38   :  { %v104_v37 = vld [vmem:[#allocation7 + $0x180] sm:$0xff]  ;;  %404 = vmatpush.msra.mxu2 %v232_v36  ;;  %v105_v36 = vld [vmem:[#allocation7 + $0x188] sm:$0xff] }
  0x39   :  { %v296_v38 = vld [vmem:[#allocation7 + $0xd80] sm:$0xff]  ;;  %364 = vmatpush.msra.mxu0 %v104_v37  ;;  %v173_v37 = vld [vmem:[#allocation7 + $0x5c8] sm:$0xff] }
  0x3a   :  { %v168_v39 = vld [vmem:[#allocation7 + $0x580] sm:$0xff]  ;;  %424 = vmatpush.msra.mxu3 %v296_v38  ;;  %v229_v38 = vld [vmem:[#allocation7 + $0x948] sm:$0xff] }
  0x3b   :  { %v228_v40 = vld [vmem:[#allocation7 + $0x940] sm:$0xff]  ;;  %384 = vmatpush.msra.mxu1 %v168_v39  ;;  %v297_v39 = vld [vmem:[#allocation7 + $0xd88] sm:$0xff] }
  0x3c   :  { %v100_v41 = vld [vmem:[#allocation7 + $0x140] sm:$0xff]  ;;  %405 = vmatpush.msra.mxu2 %v228_v40  ;;  %v101_v40 = vld [vmem:[#allocation7 + $0x148] sm:$0xff] }
  0x3d   :  { %v292_v42 = vld [vmem:[#allocation7 + $0xd40] sm:$0xff]  ;;  %365 = vmatpush.msra.mxu0 %v100_v41  ;;  %v169_v41 = vld [vmem:[#allocation7 + $0x588] sm:$0xff] }
  0x3e   :  { %v164_v43 = vld [vmem:[#allocation7 + $0x540] sm:$0xff]  ;;  %425 = vmatpush.msra.mxu3 %v292_v42  ;;  %v225_v42 = vld [vmem:[#allocation7 + $0x908] sm:$0xff] }
  0x3f   :  { %v224_v44 = vld [vmem:[#allocation7 + $0x900] sm:$0xff]  ;;  %385 = vmatpush.msra.mxu1 %v164_v43  ;;  %v293_v43 = vld [vmem:[#allocation7 + $0xd48] sm:$0xff] }
  0x40   :  { %v96_v45 = vld [vmem:[#allocation7 + $0x100] sm:$0xff]  ;;  %406 = vmatpush.msra.mxu2 %v224_v44  ;;  %v97_v44 = vld [vmem:[#allocation7 + $0x108] sm:$0xff] }
  0x41   :  { %v288_v46 = vld [vmem:[#allocation7 + $0xd00] sm:$0xff]  ;;  %366 = vmatpush.msra.mxu0 %v96_v45  ;;  %v165_v45 = vld [vmem:[#allocation7 + $0x548] sm:$0xff] }
  0x42   :  { %v160_v47 = vld [vmem:[#allocation7 + $0x500] sm:$0xff]  ;;  %426 = vmatpush.msra.mxu3 %v288_v46  ;;  %v221_v46 = vld [vmem:[#allocation7 + $0x8c8] sm:$0xff] }
  0x43   :  { %v220_v48 = vld [vmem:[#allocation7 + $0x8c0] sm:$0xff]  ;;  %386 = vmatpush.msra.mxu1 %v160_v47  ;;  %v289_v47 = vld [vmem:[#allocation7 + $0xd08] sm:$0xff] }
  0x44   :  { %v92_v49 = vld [vmem:[#allocation7 + $0xc0] sm:$0xff]  ;;  %407 = vmatpush.msra.mxu2 %v220_v48  ;;  %v93_v48 = vld [vmem:[#allocation7 + $0xc8] sm:$0xff] }
  0x45   :  { %v284_v50 = vld [vmem:[#allocation7 + $0xcc0] sm:$0xff]  ;;  %367 = vmatpush.msra.mxu0 %v92_v49  ;;  %v161_v49 = vld [vmem:[#allocation7 + $0x508] sm:$0xff] }
  0x46   :  { %v156_v51 = vld [vmem:[#allocation7 + $0x4c0] sm:$0xff]  ;;  %427 = vmatpush.msra.mxu3 %v284_v50  ;;  %v217_v50 = vld [vmem:[#allocation7 + $0x888] sm:$0xff] }
  0x47   :  { %v216_v52 = vld [vmem:[#allocation7 + $0x880] sm:$0xff]  ;;  %387 = vmatpush.msra.mxu1 %v156_v51  ;;  %v285_v51 = vld [vmem:[#allocation7 + $0xcc8] sm:$0xff] }
  0x48   :  { %v88_v53 = vld [vmem:[#allocation7 + $0x80] sm:$0xff]  ;;  %408 = vmatpush.msra.mxu2 %v216_v52  ;;  %v89_v52 = vld [vmem:[#allocation7 + $0x88] sm:$0xff] }
  0x49   :  { %v280_v54 = vld [vmem:[#allocation7 + $0xc80] sm:$0xff]  ;;  %368 = vmatpush.msra.mxu0 %v88_v53  ;;  %v157_v53 = vld [vmem:[#allocation7 + $0x4c8] sm:$0xff] }
  0x4a   :  { %v152_v55 = vld [vmem:[#allocation7 + $0x480] sm:$0xff]  ;;  %428 = vmatpush.msra.mxu3 %v280_v54  ;;  %v79_v54 = vld [vmem:[#allocation5] sm:$0xf] }
  0x4b   :  { %v212_v56 = vld [vmem:[#allocation7 + $0x840] sm:$0xff]  ;;  %388 = vmatpush.msra.mxu1 %v152_v55  ;;  %v213_v55 = vld [vmem:[#allocation7 + $0x848] sm:$0xff] }
  0x4c   :  { %v84_v57 = vld [vmem:[#allocation7 + $0x40] sm:$0xff]  ;;  %409 = vmatpush.msra.mxu2 %v212_v56  ;;  %v281_v56 = vld [vmem:[#allocation7 + $0xc88] sm:$0xff] }
  0x4d   :  { %v276_v58 = vld [vmem:[#allocation7 + $0xc40] sm:$0xff]  ;;  %369 = vmatpush.msra.mxu0 %v84_v57  ;;  %v85_v57 = vld [vmem:[#allocation7 + $0x48] sm:$0xff] }
  0x4e   :  { %v148_v59 = vld [vmem:[#allocation7 + $0x440] sm:$0xff]  ;;  %429 = vmatpush.msra.mxu3 %v276_v58  ;;  %v153_v58 = vld [vmem:[#allocation7 + $0x488] sm:$0xff] }
  0x4f   :  { %v208_v60 = vld [vmem:[#allocation7 + $0x800] sm:$0xff]  ;;  %389 = vmatpush.msra.mxu1 %v148_v59  ;;  %v209_v59 = vld [vmem:[#allocation7 + $0x808] sm:$0xff] }
  0x50   :  { %v80_v61 = vld [vmem:[#allocation7] sm:$0xff]  ;;  %410 = vmatpush.msra.mxu2 %v208_v60  ;;  %v277_v60 = vld [vmem:[#allocation7 + $0xc48] sm:$0xff] }
  0x51   :  { %v272_v63 = vld [vmem:[#allocation7 + $0xc00] sm:$0xff]  ;;  %370 = vmatpush.msra.mxu0 %v80_v61  ;;  %v1676_v61 = vperm.slane %v79_v54, 2 }
  0x52   :  { %v144_v3 = vld [vmem:[#allocation7 + $0x400] sm:$0xff]  ;;  %475 = vmatpush.msrb.mxu2 %v269_v62  ;;  %430 = vmatpush.msra.mxu3 %v272_v63  ;;  %v81_v62 = vld [vmem:[#allocation7 + $0x8] sm:$0xff]  ;;  %v270_v63 = vld [vmem:[#allocation7 + $0xbd0] sm:$0xff] }
  0x53   :  { %435 = vmatpush.msrb.mxu0 %v141_v0  ;;  %390 = vmatpush.msra.mxu1 %v144_v3  ;;  %v149_v0 = vld [vmem:[#allocation7 + $0x448] sm:$0xff]  ;;  %v1680_v3 = vperm.slane %v79_v54, 3 }
  0x54   :  { %495 = vmatpush.msrb.mxu3 %v333_v1  ;;  %476 = vmatpush.msrb.mxu2 %v265_v2  ;;  %v1678_v1 = vperm.slane %v79_v54, 0  ;;  %v273_v2 = vld [vmem:[#allocation7 + $0xc08] sm:$0xff] }
  0x55   :  { %436 = vmatpush.msrb.mxu0 %v137_v4  ;;  %455 = vmatpush.msrb.mxu1 %v205_v5  ;;  %v142_v4 = vld [vmem:[#allocation7 + $0x3d0] sm:$0xff] }
  0x56   :  { %477 = vmatpush.msrb.mxu2 %v261_v6  ;;  %496 = vmatpush.msrb.mxu3 %v329_v7  ;;  %v266_v5 = vld [vmem:[#allocation7 + $0xb90] sm:$0xff]  ;;  %v145_v7 = vld [vmem:[#allocation7 + $0x408] sm:$0xff] }
  0x57   :  { %437 = vmatpush.msrb.mxu0 %v133_v8  ;;  %456 = vmatpush.msrb.mxu1 %v201_v9  ;;  %v334_v6 = vld [vmem:[#allocation7 + $0xfd0] sm:$0xff]  ;;  %v1684_v8 = vperm.slane %v79_v54, 1 }
  0x58   :  { %478 = vmatpush.msrb.mxu2 %v257_v10  ;;  %497 = vmatpush.msrb.mxu3 %v325_v11  ;;  %v138_v9 = vld [vmem:[#allocation7 + $0x390] sm:$0xff] }
  0x59   :  { %438 = vmatpush.msrb.mxu0 %v129_v12  ;;  %457 = vmatpush.msrb.mxu1 %v197_v13  ;;  %v262_v10 = vld [vmem:[#allocation7 + $0xb50] sm:$0xff] }
  0x5a   :  { %479 = vmatpush.msrb.mxu2 %v253_v14  ;;  %498 = vmatpush.msrb.mxu3 %v321_v15  ;;  %v206_v11 = vld [vmem:[#allocation7 + $0x7d0] sm:$0xff] }
  0x5b   :  { %439 = vmatpush.msrb.mxu0 %v125_v16  ;;  %458 = vmatpush.msrb.mxu1 %v193_v17  ;;  %v330_v12 = vld [vmem:[#allocation7 + $0xf90] sm:$0xff] }
  0x5c   :  { %480 = vmatpush.msrb.mxu2 %v249_v18  ;;  %499 = vmatpush.msrb.mxu3 %v317_v19  ;;  %v134_v13 = vld [vmem:[#allocation7 + $0x350] sm:$0xff] }
  0x5d   :  { %440 = vmatpush.msrb.mxu0 %v121_v20  ;;  %459 = vmatpush.msrb.mxu1 %v189_v21  ;;  %v258_v14 = vld [vmem:[#allocation7 + $0xb10] sm:$0xff] }
  0x5e   :  { %481 = vmatpush.msrb.mxu2 %v245_v22  ;;  %500 = vmatpush.msrb.mxu3 %v313_v23  ;;  %v202_v15 = vld [vmem:[#allocation7 + $0x790] sm:$0xff] }
  0x5f   :  { %441 = vmatpush.msrb.mxu0 %v117_v24  ;;  %460 = vmatpush.msrb.mxu1 %v185_v25  ;;  %v326_v16 = vld [vmem:[#allocation7 + $0xf50] sm:$0xff] }
  0x60   :  { %482 = vmatpush.msrb.mxu2 %v241_v26  ;;  %501 = vmatpush.msrb.mxu3 %v309_v27  ;;  %v130_v17 = vld [vmem:[#allocation7 + $0x310] sm:$0xff] }
  0x61   :  { %442 = vmatpush.msrb.mxu0 %v113_v28  ;;  %461 = vmatpush.msrb.mxu1 %v181_v29  ;;  %v254_v18 = vld [vmem:[#allocation7 + $0xad0] sm:$0xff] }
  0x62   :  { %483 = vmatpush.msrb.mxu2 %v237_v30  ;;  %502 = vmatpush.msrb.mxu3 %v305_v31  ;;  %v198_v19 = vld [vmem:[#allocation7 + $0x750] sm:$0xff] }
  0x63   :  { %443 = vmatpush.msrb.mxu0 %v109_v32  ;;  %462 = vmatpush.msrb.mxu1 %v177_v33  ;;  %v322_v20 = vld [vmem:[#allocation7 + $0xf10] sm:$0xff] }
  0x64   :  { %484 = vmatpush.msrb.mxu2 %v233_v34  ;;  %503 = vmatpush.msrb.mxu3 %v301_v35  ;;  %v126_v21 = vld [vmem:[#allocation7 + $0x2d0] sm:$0xff] }
  0x65   :  { %444 = vmatpush.msrb.mxu0 %v105_v36  ;;  %463 = vmatpush.msrb.mxu1 %v173_v37  ;;  %v250_v22 = vld [vmem:[#allocation7 + $0xa90] sm:$0xff] }
  0x66   :  { %485 = vmatpush.msrb.mxu2 %v229_v38  ;;  %504 = vmatpush.msrb.mxu3 %v297_v39  ;;  %v194_v23 = vld [vmem:[#allocation7 + $0x710] sm:$0xff] }
  0x67   :  { %445 = vmatpush.msrb.mxu0 %v101_v40  ;;  %464 = vmatpush.msrb.mxu1 %v169_v41  ;;  %v318_v24 = vld [vmem:[#allocation7 + $0xed0] sm:$0xff] }
  0x68   :  { %486 = vmatpush.msrb.mxu2 %v225_v42  ;;  %505 = vmatpush.msrb.mxu3 %v293_v43  ;;  %v122_v25 = vld [vmem:[#allocation7 + $0x290] sm:$0xff] }
  0x69   :  { %446 = vmatpush.msrb.mxu0 %v97_v44  ;;  %465 = vmatpush.msrb.mxu1 %v165_v45  ;;  %v246_v26 = vld [vmem:[#allocation7 + $0xa50] sm:$0xff] }
  0x6a   :  { %487 = vmatpush.msrb.mxu2 %v221_v46  ;;  %506 = vmatpush.msrb.mxu3 %v289_v47  ;;  %v190_v27 = vld [vmem:[#allocation7 + $0x6d0] sm:$0xff] }
  0x6b   :  { %447 = vmatpush.msrb.mxu0 %v93_v48  ;;  %466 = vmatpush.msrb.mxu1 %v161_v49  ;;  %v314_v28 = vld [vmem:[#allocation7 + $0xe90] sm:$0xff] }
  0x6c   :  { %488 = vmatpush.msrb.mxu2 %v217_v50  ;;  %507 = vmatpush.msrb.mxu3 %v285_v51  ;;  %v118_v29 = vld [vmem:[#allocation7 + $0x250] sm:$0xff] }
  0x6d   :  { %448 = vmatpush.msrb.mxu0 %v89_v52  ;;  %467 = vmatpush.msrb.mxu1 %v157_v53  ;;  %v242_v30 = vld [vmem:[#allocation7 + $0xa10] sm:$0xff] }
  0x6e   :  { %489 = vmatpush.msrb.mxu2 %v213_v55  ;;  %508 = vmatpush.msrb.mxu3 %v281_v56  ;;  %v186_v31 = vld [vmem:[#allocation7 + $0x690] sm:$0xff] }
  0x6f   :  { %449 = vmatpush.msrb.mxu0 %v85_v57  ;;  %468 = vmatpush.msrb.mxu1 %v153_v58  ;;  %v310_v32 = vld [vmem:[#allocation7 + $0xe50] sm:$0xff] }
  0x70   :  { %490 = vmatpush.msrb.mxu2 %v209_v59  ;;  %509 = vmatpush.msrb.mxu3 %v277_v60  ;;  %v114_v33 = vld [vmem:[#allocation7 + $0x210] sm:$0xff] }
  0x71   :  { %411 = vmatmul.f32.vlgmr.msra.gmra.mxu2 %v1676_v61  ;;  %450 = vmatpush.msrb.mxu0 %v81_v62  ;;  %v238_v34 = vld [vmem:[#allocation7 + $0x9d0] sm:$0xff] }
  0x72   :  { %555 = vmatpush.msra.mxu2 %v270_v63  ;;  %469 = vmatpush.msrb.mxu1 %v149_v0  ;;  %v182_v35 = vld [vmem:[#allocation7 + $0x650] sm:$0xff] }
  0x73   :  { %510 = vmatpush.msrb.mxu3 %v273_v2  ;;  %371 = vmatmul.f32.vlgmr.msra.gmra.mxu0 %v1678_v1  ;;  %v306_v36 = vld [vmem:[#allocation7 + $0xe10] sm:$0xff] }
  0x74   :  { %431 = vmatmul.f32.vlgmr.msra.gmra.mxu3 %v1680_v3  ;;  %515 = vmatpush.msra.mxu0 %v142_v4  ;;  %v110_v37 = vld [vmem:[#allocation7 + $0x1d0] sm:$0xff] }
  0x75   :  { %556 = vmatpush.msra.mxu2 %v266_v5  ;;  %575 = vmatpush.msra.mxu3 %v334_v6  ;;  %v234_v38 = vld [vmem:[#allocation7 + $0x990] sm:$0xff]  ;;  %v271_v5 = vld [vmem:[#allocation7 + $0xbd8] sm:$0xff] }
  0x76   :  { %470 = vmatpush.msrb.mxu1 %v145_v7  ;;  %516 = vmatpush.msra.mxu0 %v138_v9  ;;  %v178_v39 = vld [vmem:[#allocation7 + $0x610] sm:$0xff]  ;;  %v143_v9 = vld [vmem:[#allocation7 + $0x3d8] sm:$0xff] }
  0x77   :  { %391 = vmatmul.f32.vlgmr.msra.gmra.mxu1 %v1684_v8  ;;  %557 = vmatpush.msra.mxu2 %v262_v10  ;;  %v302_v40 = vld [vmem:[#allocation7 + $0xdd0] sm:$0xff]  ;;  %v267_v10 = vld [vmem:[#allocation7 + $0xb98] sm:$0xff] }
  0x78   :  { %535 = vmatpush.msra.mxu1 %v206_v11  ;;  %576 = vmatpush.msra.mxu3 %v330_v12  ;;  %v106_v41 = vld [vmem:[#allocation7 + $0x190] sm:$0xff]  ;;  %v335_v11 = vld [vmem:[#allocation7 + $0xfd8] sm:$0xff] }
  0x79   :  { %517 = vmatpush.msra.mxu0 %v134_v13  ;;  %558 = vmatpush.msra.mxu2 %v258_v14  ;;  %v230_v42 = vld [vmem:[#allocation7 + $0x950] sm:$0xff]  ;;  %v139_v13 = vld [vmem:[#allocation7 + $0x398] sm:$0xff] }
  0x7a   :  { %536 = vmatpush.msra.mxu1 %v202_v15  ;;  %577 = vmatpush.msra.mxu3 %v326_v16  ;;  %v174_v43 = vld [vmem:[#allocation7 + $0x5d0] sm:$0xff]  ;;  %v263_v14 = vld [vmem:[#allocation7 + $0xb58] sm:$0xff] }
  0x7b   :  { %518 = vmatpush.msra.mxu0 %v130_v17  ;;  %559 = vmatpush.msra.mxu2 %v254_v18  ;;  %v298_v44 = vld [vmem:[#allocation7 + $0xd90] sm:$0xff]  ;;  %v207_v15 = vld [vmem:[#allocation7 + $0x7d8] sm:$0xff] }
  0x7c   :  { %537 = vmatpush.msra.mxu1 %v198_v19  ;;  %578 = vmatpush.msra.mxu3 %v322_v20  ;;  %v102_v45 = vld [vmem:[#allocation7 + $0x150] sm:$0xff]  ;;  %v331_v16 = vld [vmem:[#allocation7 + $0xf98] sm:$0xff] }
  0x7d   :  { %519 = vmatpush.msra.mxu0 %v126_v21  ;;  %560 = vmatpush.msra.mxu2 %v250_v22  ;;  %v226_v46 = vld [vmem:[#allocation7 + $0x910] sm:$0xff]  ;;  %v135_v17 = vld [vmem:[#allocation7 + $0x358] sm:$0xff] }
  0x7e   :  { %538 = vmatpush.msra.mxu1 %v194_v23  ;;  %579 = vmatpush.msra.mxu3 %v318_v24  ;;  %v170_v47 = vld [vmem:[#allocation7 + $0x590] sm:$0xff]  ;;  %v259_v18 = vld [vmem:[#allocation7 + $0xb18] sm:$0xff] }
  0x7f   :  { %520 = vmatpush.msra.mxu0 %v122_v25  ;;  %561 = vmatpush.msra.mxu2 %v246_v26  ;;  %v294_v48 = vld [vmem:[#allocation7 + $0xd50] sm:$0xff]  ;;  %v203_v19 = vld [vmem:[#allocation7 + $0x798] sm:$0xff] }
  0x80   :  { %539 = vmatpush.msra.mxu1 %v190_v27  ;;  %580 = vmatpush.msra.mxu3 %v314_v28  ;;  %v98_v49 = vld [vmem:[#allocation7 + $0x110] sm:$0xff]  ;;  %v327_v20 = vld [vmem:[#allocation7 + $0xf58] sm:$0xff] }
  0x81   :  { %521 = vmatpush.msra.mxu0 %v118_v29  ;;  %562 = vmatpush.msra.mxu2 %v242_v30  ;;  %v222_v50 = vld [vmem:[#allocation7 + $0x8d0] sm:$0xff]  ;;  %v131_v21 = vld [vmem:[#allocation7 + $0x318] sm:$0xff] }
  0x82   :  { %540 = vmatpush.msra.mxu1 %v186_v31  ;;  %581 = vmatpush.msra.mxu3 %v310_v32  ;;  %v166_v51 = vld [vmem:[#allocation7 + $0x550] sm:$0xff]  ;;  %v255_v22 = vld [vmem:[#allocation7 + $0xad8] sm:$0xff] }
  0x83   :  { %522 = vmatpush.msra.mxu0 %v114_v33  ;;  %563 = vmatpush.msra.mxu2 %v238_v34  ;;  %v290_v52 = vld [vmem:[#allocation7 + $0xd10] sm:$0xff]  ;;  %v199_v23 = vld [vmem:[#allocation7 + $0x758] sm:$0xff] }
  0x84   :  { %541 = vmatpush.msra.mxu1 %v182_v35  ;;  %582 = vmatpush.msra.mxu3 %v306_v36  ;;  %v94_v53 = vld [vmem:[#allocation7 + $0xd0] sm:$0xff]  ;;  %v323_v24 = vld [vmem:[#allocation7 + $0xf18] sm:$0xff] }
  0x85   :  { %523 = vmatpush.msra.mxu0 %v110_v37  ;;  %564 = vmatpush.msra.mxu2 %v234_v38  ;;  %v218_v54 = vld [vmem:[#allocation7 + $0x890] sm:$0xff]  ;;  %v127_v25 = vld [vmem:[#allocation7 + $0x2d8] sm:$0xff] }
  0x86   :  { %542 = vmatpush.msra.mxu1 %v178_v39  ;;  %583 = vmatpush.msra.mxu3 %v302_v40  ;;  %v162_v55 = vld [vmem:[#allocation7 + $0x510] sm:$0xff]  ;;  %v251_v26 = vld [vmem:[#allocation7 + $0xa98] sm:$0xff] }
  0x87   :  { %524 = vmatpush.msra.mxu0 %v106_v41  ;;  %565 = vmatpush.msra.mxu2 %v230_v42  ;;  %v286_v56 = vld [vmem:[#allocation7 + $0xcd0] sm:$0xff]  ;;  %v195_v27 = vld [vmem:[#allocation7 + $0x718] sm:$0xff] }
  0x88   :  { %543 = vmatpush.msra.mxu1 %v174_v43  ;;  %584 = vmatpush.msra.mxu3 %v298_v44  ;;  %v90_v57 = vld [vmem:[#allocation7 + $0x90] sm:$0xff]  ;;  %v319_v28 = vld [vmem:[#allocation7 + $0xed8] sm:$0xff] }
  0x89   :  { %525 = vmatpush.msra.mxu0 %v102_v45  ;;  %566 = vmatpush.msra.mxu2 %v226_v46  ;;  %v214_v58 = vld [vmem:[#allocation7 + $0x850] sm:$0xff]  ;;  %v123_v29 = vld [vmem:[#allocation7 + $0x298] sm:$0xff] }
  0x8a   :  { %544 = vmatpush.msra.mxu1 %v170_v47  ;;  %585 = vmatpush.msra.mxu3 %v294_v48  ;;  %v158_v59 = vld [vmem:[#allocation7 + $0x4d0] sm:$0xff]  ;;  %v247_v30 = vld [vmem:[#allocation7 + $0xa58] sm:$0xff] }
  0x8b   :  { %526 = vmatpush.msra.mxu0 %v98_v49  ;;  %567 = vmatpush.msra.mxu2 %v222_v50  ;;  %v282_v60 = vld [vmem:[#allocation7 + $0xc90] sm:$0xff]  ;;  %v191_v31 = vld [vmem:[#allocation7 + $0x6d8] sm:$0xff] }
  0x8c   :  { %545 = vmatpush.msra.mxu1 %v166_v51  ;;  %586 = vmatpush.msra.mxu3 %v290_v52  ;;  %v86_v62 = vld [vmem:[#allocation7 + $0x50] sm:$0xff]  ;;  %v315_v32 = vld [vmem:[#allocation7 + $0xe98] sm:$0xff] }
  0x8d   :  { %527 = vmatpush.msra.mxu0 %v94_v53  ;;  %568 = vmatpush.msra.mxu2 %v218_v54  ;;  %v210_v63 = vld [vmem:[#allocation7 + $0x810] sm:$0xff]  ;;  %v119_v33 = vld [vmem:[#allocation7 + $0x258] sm:$0xff] }
  0x8e   :  { %546 = vmatpush.msra.mxu1 %v162_v55  ;;  %587 = vmatpush.msra.mxu3 %v286_v56  ;;  %v154_v0 = vld [vmem:[#allocation7 + $0x490] sm:$0xff]  ;;  %v243_v34 = vld [vmem:[#allocation7 + $0xa18] sm:$0xff] }
  0x8f   :  { %528 = vmatpush.msra.mxu0 %v90_v57  ;;  %569 = vmatpush.msra.mxu2 %v214_v58  ;;  %v278_v2 = vld [vmem:[#allocation7 + $0xc50] sm:$0xff]  ;;  %v187_v35 = vld [vmem:[#allocation7 + $0x698] sm:$0xff] }
  0x90   :  { %547 = vmatpush.msra.mxu1 %v158_v59  ;;  %588 = vmatpush.msra.mxu3 %v282_v60  ;;  %v82_v4 = vld [vmem:[#allocation7 + $0x10] sm:$0xff]  ;;  %v311_v36 = vld [vmem:[#allocation7 + $0xe58] sm:$0xff] }
  0x91   :  { %529 = vmatpush.msra.mxu0 %v86_v62  ;;  %570 = vmatpush.msra.mxu2 %v210_v63  ;;  %v150_v6 = vld [vmem:[#allocation7 + $0x450] sm:$0xff]  ;;  %v115_v37 = vld [vmem:[#allocation7 + $0x218] sm:$0xff] }
  0x92   :  { %548 = vmatpush.msra.mxu1 %v154_v0  ;;  %589 = vmatpush.msra.mxu3 %v278_v2  ;;  %v274_v7 = vld [vmem:[#allocation7 + $0xc10] sm:$0xff]  ;;  %v239_v38 = vld [vmem:[#allocation7 + $0x9d8] sm:$0xff] }
  0x93   :  { %491 = vmatmul.f32.vlgmr.msrb.gmra.mxu2 %v1676_v61  ;;  %530 = vmatpush.msra.mxu0 %v82_v4  ;;  %v146_v12 = vld [vmem:[#allocation7 + $0x410] sm:$0xff]  ;;  %v183_v39 = vld [vmem:[#allocation7 + $0x658] sm:$0xff] }
  0x94   :  { %635 = vmatpush.msrb.mxu2 %v271_v5  ;;  %549 = vmatpush.msra.mxu1 %v150_v6  ;;  %v307_v40 = vld [vmem:[#allocation7 + $0xe18] sm:$0xff] }
  0x95   :  { %590 = vmatpush.msra.mxu3 %v274_v7  ;;  %451 = vmatmul.f32.vlgmr.msrb.gmra.mxu0 %v1678_v1  ;;  %v111_v41 = vld [vmem:[#allocation7 + $0x1d8] sm:$0xff] }
  0x96   :  { %511 = vmatmul.f32.vlgmr.msrb.gmra.mxu3 %v1680_v3  ;;  %595 = vmatpush.msrb.mxu0 %v143_v9  ;;  %v235_v42 = vld [vmem:[#allocation7 + $0x998] sm:$0xff] }
  0x97   :  { %636 = vmatpush.msrb.mxu2 %v267_v10  ;;  %655 = vmatpush.msrb.mxu3 %v335_v11  ;;  %v179_v43 = vld [vmem:[#allocation7 + $0x618] sm:$0xff]  ;;  %v863_v10 = vld [vmem:[#allocation7 + $0xbe0] sm:$0xff] }
  0x98   :  { %550 = vmatpush.msra.mxu1 %v146_v12  ;;  %596 = vmatpush.msrb.mxu0 %v139_v13  ;;  %v303_v44 = vld [vmem:[#allocation7 + $0xdd8] sm:$0xff]  ;;  %v735_v13 = vld [vmem:[#allocation7 + $0x3e0] sm:$0xff] }
  0x99   :  { %471 = vmatmul.f32.vlgmr.msrb.gmra.mxu1 %v1684_v8  ;;  %637 = vmatpush.msrb.mxu2 %v263_v14  ;;  %v107_v45 = vld [vmem:[#allocation7 + $0x198] sm:$0xff]  ;;  %v859_v14 = vld [vmem:[#allocation7 + $0xba0] sm:$0xff] }
  0x9a   :  { %615 = vmatpush.msrb.mxu1 %v207_v15  ;;  %656 = vmatpush.msrb.mxu3 %v331_v16  ;;  %v231_v46 = vld [vmem:[#allocation7 + $0x958] sm:$0xff]  ;;  %v927_v15 = vld [vmem:[#allocation7 + $0xfe0] sm:$0xff] }
  0x9b   :  { %597 = vmatpush.msrb.mxu0 %v135_v17  ;;  %638 = vmatpush.msrb.mxu2 %v259_v18  ;;  %v175_v47 = vld [vmem:[#allocation7 + $0x5d8] sm:$0xff]  ;;  %v731_v17 = vld [vmem:[#allocation7 + $0x3a0] sm:$0xff] }
  0x9c   :  { %616 = vmatpush.msrb.mxu1 %v203_v19  ;;  %657 = vmatpush.msrb.mxu3 %v327_v20  ;;  %v299_v48 = vld [vmem:[#allocation7 + $0xd98] sm:$0xff]  ;;  %v855_v18 = vld [vmem:[#allocation7 + $0xb60] sm:$0xff] }
  0x9d   :  { %598 = vmatpush.msrb.mxu0 %v131_v21  ;;  %639 = vmatpush.msrb.mxu2 %v255_v22  ;;  %v103_v49 = vld [vmem:[#allocation7 + $0x158] sm:$0xff]  ;;  %v799_v19 = vld [vmem:[#allocation7 + $0x7e0] sm:$0xff] }
  0x9e   :  { %617 = vmatpush.msrb.mxu1 %v199_v23  ;;  %658 = vmatpush.msrb.mxu3 %v323_v24  ;;  %v227_v50 = vld [vmem:[#allocation7 + $0x918] sm:$0xff]  ;;  %v923_v20 = vld [vmem:[#allocation7 + $0xfa0] sm:$0xff] }
  0x9f   :  { %599 = vmatpush.msrb.mxu0 %v127_v25  ;;  %640 = vmatpush.msrb.mxu2 %v251_v26  ;;  %v171_v51 = vld [vmem:[#allocation7 + $0x598] sm:$0xff]  ;;  %v727_v21 = vld [vmem:[#allocation7 + $0x360] sm:$0xff] }
  0xa0   :  { %618 = vmatpush.msrb.mxu1 %v195_v27  ;;  %659 = vmatpush.msrb.mxu3 %v319_v28  ;;  %v295_v52 = vld [vmem:[#allocation7 + $0xd58] sm:$0xff]  ;;  %v851_v22 = vld [vmem:[#allocation7 + $0xb20] sm:$0xff] }
  0xa1   :  { %600 = vmatpush.msrb.mxu0 %v123_v29  ;;  %641 = vmatpush.msrb.mxu2 %v247_v30  ;;  %v99_v53 = vld [vmem:[#allocation7 + $0x118] sm:$0xff]  ;;  %v795_v23 = vld [vmem:[#allocation7 + $0x7a0] sm:$0xff] }
  0xa2   :  { %619 = vmatpush.msrb.mxu1 %v191_v31  ;;  %660 = vmatpush.msrb.mxu3 %v315_v32  ;;  %v223_v54 = vld [vmem:[#allocation7 + $0x8d8] sm:$0xff]  ;;  %v919_v24 = vld [vmem:[#allocation7 + $0xf60] sm:$0xff] }
  0xa3   :  { %601 = vmatpush.msrb.mxu0 %v119_v33  ;;  %642 = vmatpush.msrb.mxu2 %v243_v34  ;;  %v167_v55 = vld [vmem:[#allocation7 + $0x558] sm:$0xff]  ;;  %v723_v25 = vld [vmem:[#allocation7 + $0x320] sm:$0xff] }
  0xa4   :  { %620 = vmatpush.msrb.mxu1 %v187_v35  ;;  %661 = vmatpush.msrb.mxu3 %v311_v36  ;;  %v291_v56 = vld [vmem:[#allocation7 + $0xd18] sm:$0xff]  ;;  %v847_v26 = vld [vmem:[#allocation7 + $0xae0] sm:$0xff] }
  0xa5   :  { %602 = vmatpush.msrb.mxu0 %v115_v37  ;;  %643 = vmatpush.msrb.mxu2 %v239_v38  ;;  %v95_v57 = vld [vmem:[#allocation7 + $0xd8] sm:$0xff]  ;;  %v791_v27 = vld [vmem:[#allocation7 + $0x760] sm:$0xff] }
  0xa6   :  { %621 = vmatpush.msrb.mxu1 %v183_v39  ;;  %662 = vmatpush.msrb.mxu3 %v307_v40  ;;  %v219_v58 = vld [vmem:[#allocation7 + $0x898] sm:$0xff]  ;;  %v915_v28 = vld [vmem:[#allocation7 + $0xf20] sm:$0xff] }
  0xa7   :  { %603 = vmatpush.msrb.mxu0 %v111_v41  ;;  %644 = vmatpush.msrb.mxu2 %v235_v42  ;;  %v163_v59 = vld [vmem:[#allocation7 + $0x518] sm:$0xff]  ;;  %v719_v29 = vld [vmem:[#allocation7 + $0x2e0] sm:$0xff] }
  0xa8   :  { %622 = vmatpush.msrb.mxu1 %v179_v43  ;;  %663 = vmatpush.msrb.mxu3 %v303_v44  ;;  %v287_v60 = vld [vmem:[#allocation7 + $0xcd8] sm:$0xff]  ;;  %v843_v30 = vld [vmem:[#allocation7 + $0xaa0] sm:$0xff] }
  0xa9   :  { %604 = vmatpush.msrb.mxu0 %v107_v45  ;;  %645 = vmatpush.msrb.mxu2 %v231_v46  ;;  %v91_v62 = vld [vmem:[#allocation7 + $0x98] sm:$0xff]  ;;  %v787_v31 = vld [vmem:[#allocation7 + $0x720] sm:$0xff] }
  0xaa   :  { %623 = vmatpush.msrb.mxu1 %v175_v47  ;;  %664 = vmatpush.msrb.mxu3 %v299_v48  ;;  %v215_v63 = vld [vmem:[#allocation7 + $0x858] sm:$0xff]  ;;  %v911_v32 = vld [vmem:[#allocation7 + $0xee0] sm:$0xff] }
  0xab   :  { %605 = vmatpush.msrb.mxu0 %v103_v49  ;;  %646 = vmatpush.msrb.mxu2 %v227_v50  ;;  %v159_v0 = vld [vmem:[#allocation7 + $0x4d8] sm:$0xff]  ;;  %v715_v33 = vld [vmem:[#allocation7 + $0x2a0] sm:$0xff] }
  0xac   :  { %624 = vmatpush.msrb.mxu1 %v171_v51  ;;  %665 = vmatpush.msrb.mxu3 %v295_v52  ;;  %v283_v2 = vld [vmem:[#allocation7 + $0xc98] sm:$0xff]  ;;  %v839_v34 = vld [vmem:[#allocation7 + $0xa60] sm:$0xff] }
  0xad   :  { %606 = vmatpush.msrb.mxu0 %v99_v53  ;;  %647 = vmatpush.msrb.mxu2 %v223_v54  ;;  %v87_v4 = vld [vmem:[#allocation7 + $0x58] sm:$0xff]  ;;  %v783_v35 = vld [vmem:[#allocation7 + $0x6e0] sm:$0xff] }
  0xae   :  { %625 = vmatpush.msrb.mxu1 %v167_v55  ;;  %666 = vmatpush.msrb.mxu3 %v291_v56  ;;  %v211_v5 = vld [vmem:[#allocation7 + $0x818] sm:$0xff]  ;;  %v907_v36 = vld [vmem:[#allocation7 + $0xea0] sm:$0xff] }
  0xaf   :  { %607 = vmatpush.msrb.mxu0 %v95_v57  ;;  %648 = vmatpush.msrb.mxu2 %v219_v58  ;;  %v155_v6 = vld [vmem:[#allocation7 + $0x498] sm:$0xff]  ;;  %v711_v37 = vld [vmem:[#allocation7 + $0x260] sm:$0xff] }
  0xb0   :  { %626 = vmatpush.msrb.mxu1 %v163_v59  ;;  %667 = vmatpush.msrb.mxu3 %v287_v60  ;;  %v279_v7 = vld [vmem:[#allocation7 + $0xc58] sm:$0xff]  ;;  %v835_v38 = vld [vmem:[#allocation7 + $0xa20] sm:$0xff] }
  0xb1   :  { %608 = vmatpush.msrb.mxu0 %v91_v62  ;;  %649 = vmatpush.msrb.mxu2 %v215_v63  ;;  %v83_v9 = vld [vmem:[#allocation7 + $0x18] sm:$0xff]  ;;  %v779_v39 = vld [vmem:[#allocation7 + $0x6a0] sm:$0xff] }
  0xb2   :  { %627 = vmatpush.msrb.mxu1 %v159_v0  ;;  %668 = vmatpush.msrb.mxu3 %v283_v2  ;;  %v151_v11 = vld [vmem:[#allocation7 + $0x458] sm:$0xff]  ;;  %v903_v40 = vld [vmem:[#allocation7 + $0xe60] sm:$0xff] }
  0xb3   :  { %609 = vmatpush.msrb.mxu0 %v87_v4  ;;  %650 = vmatpush.msrb.mxu2 %v211_v5  ;;  %v275_v12 = vld [vmem:[#allocation7 + $0xc18] sm:$0xff]  ;;  %v707_v41 = vld [vmem:[#allocation7 + $0x220] sm:$0xff] }
  0xb4   :  { %628 = vmatpush.msrb.mxu1 %v155_v6  ;;  %669 = vmatpush.msrb.mxu3 %v279_v7  ;;  %v147_v16 = vld [vmem:[#allocation7 + $0x418] sm:$0xff]  ;;  %v831_v42 = vld [vmem:[#allocation7 + $0x9e0] sm:$0xff] }
  0xb5   :  { %571 = vmatmul.f32.vlgmr.msra.gmra.mxu2 %v1676_v61  ;;  %610 = vmatpush.msrb.mxu0 %v83_v9  ;;  %v775_v43 = vld [vmem:[#allocation7 + $0x660] sm:$0xff] }
  0xb6   :  { %981 = vmatpush.msra.mxu2 %v863_v10  ;;  %629 = vmatpush.msrb.mxu1 %v151_v11  ;;  %v899_v44 = vld [vmem:[#allocation7 + $0xe20] sm:$0xff] }
  0xb7   :  { %670 = vmatpush.msrb.mxu3 %v275_v12  ;;  %531 = vmatmul.f32.vlgmr.msra.gmra.mxu0 %v1678_v1  ;;  %v703_v45 = vld [vmem:[#allocation7 + $0x1e0] sm:$0xff]  ;;  %v864_v12 = vld [vmem:[#allocation7 + $0xbe8] sm:$0xff] }
  0xb8   :  { %591 = vmatmul.f32.vlgmr.msra.gmra.mxu3 %v1680_v3  ;;  %941 = vmatpush.msra.mxu0 %v735_v13  ;;  %v827_v46 = vld [vmem:[#allocation7 + $0x9a0] sm:$0xff] }
  0xb9   :  { %982 = vmatpush.msra.mxu2 %v859_v14  ;;  %1001 = vmatpush.msra.mxu3 %v927_v15  ;;  %v771_v47 = vld [vmem:[#allocation7 + $0x620] sm:$0xff] }
  0xba   :  { %630 = vmatpush.msrb.mxu1 %v147_v16  ;;  %942 = vmatpush.msra.mxu0 %v731_v17  ;;  %v895_v48 = vld [vmem:[#allocation7 + $0xde0] sm:$0xff]  ;;  %v736_v16 = vld [vmem:[#allocation7 + $0x3e8] sm:$0xff] }
  0xbb   :  { %551 = vmatmul.f32.vlgmr.msra.gmra.mxu1 %v1684_v8  ;;  %983 = vmatpush.msra.mxu2 %v855_v18  ;;  %v699_v49 = vld [vmem:[#allocation7 + $0x1a0] sm:$0xff]  ;;  %v860_v17 = vld [vmem:[#allocation7 + $0xba8] sm:$0xff] }
  0xbc   :  { %961 = vmatpush.msra.mxu1 %v799_v19  ;;  %1002 = vmatpush.msra.mxu3 %v923_v20  ;;  %v823_v50 = vld [vmem:[#allocation7 + $0x960] sm:$0xff]  ;;  %v928_v18 = vld [vmem:[#allocation7 + $0xfe8] sm:$0xff] }
  0xbd   :  { %943 = vmatpush.msra.mxu0 %v727_v21  ;;  %984 = vmatpush.msra.mxu2 %v851_v22  ;;  %v767_v51 = vld [vmem:[#allocation7 + $0x5e0] sm:$0xff]  ;;  %v732_v20 = vld [vmem:[#allocation7 + $0x3a8] sm:$0xff] }
  0xbe   :  { %962 = vmatpush.msra.mxu1 %v795_v23  ;;  %1003 = vmatpush.msra.mxu3 %v919_v24  ;;  %v891_v52 = vld [vmem:[#allocation7 + $0xda0] sm:$0xff]  ;;  %v856_v22 = vld [vmem:[#allocation7 + $0xb68] sm:$0xff] }
  0xbf   :  { %944 = vmatpush.msra.mxu0 %v723_v25  ;;  %985 = vmatpush.msra.mxu2 %v847_v26  ;;  %v695_v53 = vld [vmem:[#allocation7 + $0x160] sm:$0xff]  ;;  %v800_v23 = vld [vmem:[#allocation7 + $0x7e8] sm:$0xff] }
  0xc0   :  { %963 = vmatpush.msra.mxu1 %v791_v27  ;;  %1004 = vmatpush.msra.mxu3 %v915_v28  ;;  %v819_v54 = vld [vmem:[#allocation7 + $0x920] sm:$0xff]  ;;  %v924_v24 = vld [vmem:[#allocation7 + $0xfa8] sm:$0xff] }
  0xc1   :  { %945 = vmatpush.msra.mxu0 %v719_v29  ;;  %986 = vmatpush.msra.mxu2 %v843_v30  ;;  %v763_v55 = vld [vmem:[#allocation7 + $0x5a0] sm:$0xff]  ;;  %v728_v25 = vld [vmem:[#allocation7 + $0x368] sm:$0xff] }
  0xc2   :  { %964 = vmatpush.msra.mxu1 %v787_v31  ;;  %1005 = vmatpush.msra.mxu3 %v911_v32  ;;  %v887_v56 = vld [vmem:[#allocation7 + $0xd60] sm:$0xff]  ;;  %v852_v26 = vld [vmem:[#allocation7 + $0xb28] sm:$0xff] }
  0xc3   :  { %946 = vmatpush.msra.mxu0 %v715_v33  ;;  %987 = vmatpush.msra.mxu2 %v839_v34  ;;  %v691_v57 = vld [vmem:[#allocation7 + $0x120] sm:$0xff]  ;;  %v796_v27 = vld [vmem:[#allocation7 + $0x7a8] sm:$0xff] }
  0xc4   :  { %965 = vmatpush.msra.mxu1 %v783_v35  ;;  %1006 = vmatpush.msra.mxu3 %v907_v36  ;;  %v759_v58 = vld [vmem:[#allocation7 + $0x560] sm:$0xff]  ;;  %v920_v28 = vld [vmem:[#allocation7 + $0xf68] sm:$0xff] }
  0xc5   :  { %947 = vmatpush.msra.mxu0 %v711_v37  ;;  %988 = vmatpush.msra.mxu2 %v835_v38  ;;  %v815_v59 = vld [vmem:[#allocation7 + $0x8e0] sm:$0xff]  ;;  %v724_v29 = vld [vmem:[#allocation7 + $0x328] sm:$0xff] }
  0xc6   :  { %966 = vmatpush.msra.mxu1 %v779_v39  ;;  %1007 = vmatpush.msra.mxu3 %v903_v40  ;;  %v883_v60 = vld [vmem:[#allocation7 + $0xd20] sm:$0xff]  ;;  %v848_v30 = vld [vmem:[#allocation7 + $0xae8] sm:$0xff] }
  0xc7   :  { %948 = vmatpush.msra.mxu0 %v707_v41  ;;  %989 = vmatpush.msra.mxu2 %v831_v42  ;;  %v687_v62 = vld [vmem:[#allocation7 + $0xe0] sm:$0xff]  ;;  %v792_v31 = vld [vmem:[#allocation7 + $0x768] sm:$0xff] }
  0xc8   :  { %967 = vmatpush.msra.mxu1 %v775_v43  ;;  %1008 = vmatpush.msra.mxu3 %v899_v44  ;;  %v755_v63 = vld [vmem:[#allocation7 + $0x520] sm:$0xff]  ;;  %v916_v32 = vld [vmem:[#allocation7 + $0xf28] sm:$0xff] }
  0xc9   :  { %949 = vmatpush.msra.mxu0 %v703_v45  ;;  %990 = vmatpush.msra.mxu2 %v827_v46  ;;  %v811_v0 = vld [vmem:[#allocation7 + $0x8a0] sm:$0xff]  ;;  %v720_v33 = vld [vmem:[#allocation7 + $0x2e8] sm:$0xff] }
  0xca   :  { %968 = vmatpush.msra.mxu1 %v771_v47  ;;  %1009 = vmatpush.msra.mxu3 %v895_v48  ;;  %v879_v2 = vld [vmem:[#allocation7 + $0xce0] sm:$0xff]  ;;  %v844_v34 = vld [vmem:[#allocation7 + $0xaa8] sm:$0xff] }
  0xcb   :  { %950 = vmatpush.msra.mxu0 %v699_v49  ;;  %991 = vmatpush.msra.mxu2 %v823_v50  ;;  %v683_v4 = vld [vmem:[#allocation7 + $0xa0] sm:$0xff]  ;;  %v788_v35 = vld [vmem:[#allocation7 + $0x728] sm:$0xff] }
  0xcc   :  { %969 = vmatpush.msra.mxu1 %v767_v51  ;;  %1010 = vmatpush.msra.mxu3 %v891_v52  ;;  %v751_v5 = vld [vmem:[#allocation7 + $0x4e0] sm:$0xff]  ;;  %v912_v36 = vld [vmem:[#allocation7 + $0xee8] sm:$0xff] }
  0xcd   :  { %951 = vmatpush.msra.mxu0 %v695_v53  ;;  %992 = vmatpush.msra.mxu2 %v819_v54  ;;  %v807_v6 = vld [vmem:[#allocation7 + $0x860] sm:$0xff]  ;;  %v716_v37 = vld [vmem:[#allocation7 + $0x2a8] sm:$0xff] }
  0xce   :  { %970 = vmatpush.msra.mxu1 %v763_v55  ;;  %1011 = vmatpush.msra.mxu3 %v887_v56  ;;  %v875_v7 = vld [vmem:[#allocation7 + $0xca0] sm:$0xff]  ;;  %v840_v38 = vld [vmem:[#allocation7 + $0xa68] sm:$0xff] }
  0xcf   :  { %651 = vmatmul.f32.vlgmr.msrb.gmra.mxu2 %v1676_v61  ;;  %952 = vmatpush.msra.mxu0 %v691_v57  ;;  %v679_v61 = vld [vmem:[#allocation7 + $0x60] sm:$0xff]  ;;  %v784_v39 = vld [vmem:[#allocation7 + $0x6e8] sm:$0xff] }
  0xd0   :  { %971 = vmatpush.msra.mxu1 %v759_v58  ;;  %993 = vmatpush.msra.mxu2 %v815_v59  ;;  %v747_v9 = vld [vmem:[#allocation7 + $0x4a0] sm:$0xff]  ;;  %v908_v40 = vld [vmem:[#allocation7 + $0xea8] sm:$0xff] }
  0xd1   :  { %1012 = vmatpush.msra.mxu3 %v883_v60  ;;  %611 = vmatmul.f32.vlgmr.msrb.gmra.mxu0 %v1678_v1  ;;  %v803_v10 = vld [vmem:[#allocation7 + $0x820] sm:$0xff]  ;;  %v1700_v1 = vld [vmem:[#allocation2 + $0x10] sm:$0xff] }
  0xd2   :  { %671 = vmatmul.f32.vlgmr.msrb.gmra.mxu3 %v1680_v3  ;;  %953 = vmatpush.msra.mxu0 %v687_v62  ;;  %v871_v11 = vld [vmem:[#allocation7 + $0xc60] sm:$0xff]  ;;  %v712_v41 = vld [vmem:[#allocation7 + $0x268] sm:$0xff] }
  0xd3   :  { %972 = vmatpush.msra.mxu1 %v755_v63  ;;  %994 = vmatpush.msra.mxu2 %v811_v0  ;;  %v675_v3 = vld [vmem:[#allocation7 + $0x20] sm:$0xff]  ;;  %v836_v42 = vld [vmem:[#allocation7 + $0xa28] sm:$0xff] }
  0xd4   :  { %1013 = vmatpush.msra.mxu3 %v879_v2  ;;  %631 = vmatmul.f32.vlgmr.msrb.gmra.mxu1 %v1684_v8  ;;  %v743_v13 = vld [vmem:[#allocation7 + $0x460] sm:$0xff]  ;;  %v1705_v8 = vld [vmem:[#allocation2 + $0x18] sm:$0xff]  ;;  %v780_v43 = vld [vmem:[#allocation7 + $0x6a8] sm:$0xff] }
  0xd5   :  { %954 = vmatpush.msra.mxu0 %v683_v4  ;;  %973 = vmatpush.msra.mxu1 %v751_v5  ;;  %v867_v14 = vld [vmem:[#allocation7 + $0xc20] sm:$0xff]  ;;  %v904_v44 = vld [vmem:[#allocation7 + $0xe68] sm:$0xff] }
  0xd6   :  { %995 = vmatpush.msra.mxu2 %v807_v6  ;;  %1014 = vmatpush.msra.mxu3 %v875_v7  ;;  %v1702_v15 = vld [vmem:[#allocation2] sm:$0xff]  ;;  %v1709_v21 = vld [vmem:[#allocation2 + $0x8] sm:$0xff] }
  0xd7   :  { %955 = vmatpush.msra.mxu0 %v679_v61  ;;  %974 = vmatpush.msra.mxu1 %v747_v9  ;;  %v739_v19 = vld [vmem:[#allocation7 + $0x420] sm:$0xff]  ;;  %v708_v45 = vld [vmem:[#allocation7 + $0x228] sm:$0xff] }
  0xd8   :  { %996 = vmatpush.msra.mxu2 %v803_v10  ;;  %1015 = vmatpush.msra.mxu3 %v871_v11  ;;  %v832_v46 = vld [vmem:[#allocation7 + $0x9e8] sm:$0xff] }
  0xd9   :  { %997 = vmatmul.f32.vlgmr.msra.gmra.mxu2 %v1700_v1  ;;  %956 = vmatpush.msra.mxu0 %v675_v3  ;;  %v776_v47 = vld [vmem:[#allocation7 + $0x668] sm:$0xff] }
  0xda   :  { %1061 = vmatpush.msrb.mxu2 %v864_v12  ;;  %975 = vmatpush.msra.mxu1 %v743_v13  ;;  %v900_v48 = vld [vmem:[#allocation7 + $0xe28] sm:$0xff] }
  0xdb   :  { %1016 = vmatpush.msra.mxu3 %v867_v14  ;;  %957 = vmatmul.f32.vlgmr.msra.gmra.mxu0 %v1702_v15  ;;  %v704_v49 = vld [vmem:[#allocation7 + $0x1e8] sm:$0xff] }
  0xdc   :  { %1017 = vmatmul.f32.vlgmr.msra.gmra.mxu3 %v1705_v8  ;;  %1021 = vmatpush.msrb.mxu0 %v736_v16  ;;  %v828_v50 = vld [vmem:[#allocation7 + $0x9a8] sm:$0xff] }
  0xdd   :  { %1062 = vmatpush.msrb.mxu2 %v860_v17  ;;  %1081 = vmatpush.msrb.mxu3 %v928_v18  ;;  %v772_v51 = vld [vmem:[#allocation7 + $0x628] sm:$0xff]  ;;  %v865_v17 = vld [vmem:[#allocation7 + $0xbf0] sm:$0xff] }
  0xde   :  { %976 = vmatpush.msra.mxu1 %v739_v19  ;;  %1022 = vmatpush.msrb.mxu0 %v732_v20  ;;  %v896_v52 = vld [vmem:[#allocation7 + $0xde8] sm:$0xff]  ;;  %v737_v20 = vld [vmem:[#allocation7 + $0x3f0] sm:$0xff] }
  0xdf   :  { %977 = vmatmul.f32.vlgmr.msra.gmra.mxu1 %v1709_v21  ;;  %1063 = vmatpush.msrb.mxu2 %v856_v22  ;;  %v700_v53 = vld [vmem:[#allocation7 + $0x1a8] sm:$0xff]  ;;  %v861_v22 = vld [vmem:[#allocation7 + $0xbb0] sm:$0xff] }
  0xe0   :  { %1041 = vmatpush.msrb.mxu1 %v800_v23  ;;  %1082 = vmatpush.msrb.mxu3 %v924_v24  ;;  %v824_v54 = vld [vmem:[#allocation7 + $0x968] sm:$0xff]  ;;  %v929_v23 = vld [vmem:[#allocation7 + $0xff0] sm:$0xff] }
  0xe1   :  { %1023 = vmatpush.msrb.mxu0 %v728_v25  ;;  %1064 = vmatpush.msrb.mxu2 %v852_v26  ;;  %v768_v55 = vld [vmem:[#allocation7 + $0x5e8] sm:$0xff]  ;;  %v733_v25 = vld [vmem:[#allocation7 + $0x3b0] sm:$0xff] }
  0xe2   :  { %1042 = vmatpush.msrb.mxu1 %v796_v27  ;;  %1083 = vmatpush.msrb.mxu3 %v920_v28  ;;  %v892_v56 = vld [vmem:[#allocation7 + $0xda8] sm:$0xff]  ;;  %v857_v26 = vld [vmem:[#allocation7 + $0xb70] sm:$0xff] }
  0xe3   :  { %1024 = vmatpush.msrb.mxu0 %v724_v29  ;;  %1065 = vmatpush.msrb.mxu2 %v848_v30  ;;  %v696_v57 = vld [vmem:[#allocation7 + $0x168] sm:$0xff]  ;;  %v801_v27 = vld [vmem:[#allocation7 + $0x7f0] sm:$0xff] }
  0xe4   :  { %1043 = vmatpush.msrb.mxu1 %v792_v31  ;;  %1084 = vmatpush.msrb.mxu3 %v916_v32  ;;  %v820_v58 = vld [vmem:[#allocation7 + $0x928] sm:$0xff]  ;;  %v925_v28 = vld [vmem:[#allocation7 + $0xfb0] sm:$0xff] }
  0xe5   :  { %1025 = vmatpush.msrb.mxu0 %v720_v33  ;;  %1066 = vmatpush.msrb.mxu2 %v844_v34  ;;  %v764_v59 = vld [vmem:[#allocation7 + $0x5a8] sm:$0xff]  ;;  %v729_v29 = vld [vmem:[#allocation7 + $0x370] sm:$0xff] }
  0xe6   :  { %1044 = vmatpush.msrb.mxu1 %v788_v35  ;;  %1085 = vmatpush.msrb.mxu3 %v912_v36  ;;  %v888_v60 = vld [vmem:[#allocation7 + $0xd68] sm:$0xff]  ;;  %v853_v30 = vld [vmem:[#allocation7 + $0xb30] sm:$0xff] }
  0xe7   :  { %1026 = vmatpush.msrb.mxu0 %v716_v37  ;;  %1067 = vmatpush.msrb.mxu2 %v840_v38  ;;  %v692_v62 = vld [vmem:[#allocation7 + $0x128] sm:$0xff]  ;;  %v797_v31 = vld [vmem:[#allocation7 + $0x7b0] sm:$0xff] }
  0xe8   :  { %1045 = vmatpush.msrb.mxu1 %v784_v39  ;;  %1086 = vmatpush.msrb.mxu3 %v908_v40  ;;  %v816_v63 = vld [vmem:[#allocation7 + $0x8e8] sm:$0xff]  ;;  %v921_v32 = vld [vmem:[#allocation7 + $0xf70] sm:$0xff] }
  0xe9   :  { %1027 = vmatpush.msrb.mxu0 %v712_v41  ;;  %1068 = vmatpush.msrb.mxu2 %v836_v42  ;;  %v760_v0 = vld [vmem:[#allocation7 + $0x568] sm:$0xff]  ;;  %v725_v33 = vld [vmem:[#allocation7 + $0x330] sm:$0xff] }
  0xea   :  { %1046 = vmatpush.msrb.mxu1 %v780_v43  ;;  %1087 = vmatpush.msrb.mxu3 %v904_v44  ;;  %v884_v2 = vld [vmem:[#allocation7 + $0xd28] sm:$0xff]  ;;  %v849_v34 = vld [vmem:[#allocation7 + $0xaf0] sm:$0xff] }
  0xeb   :  { %1028 = vmatpush.msrb.mxu0 %v708_v45  ;;  %1069 = vmatpush.msrb.mxu2 %v832_v46  ;;  %v688_v4 = vld [vmem:[#allocation7 + $0xe8] sm:$0xff]  ;;  %v793_v35 = vld [vmem:[#allocation7 + $0x770] sm:$0xff] }
  0xec   :  { %1047 = vmatpush.msrb.mxu1 %v776_v47  ;;  %1088 = vmatpush.msrb.mxu3 %v900_v48  ;;  %v812_v5 = vld [vmem:[#allocation7 + $0x8a8] sm:$0xff]  ;;  %v917_v36 = vld [vmem:[#allocation7 + $0xf30] sm:$0xff] }
  0xed   :  { %1029 = vmatpush.msrb.mxu0 %v704_v49  ;;  %1070 = vmatpush.msrb.mxu2 %v828_v50  ;;  %v756_v6 = vld [vmem:[#allocation7 + $0x528] sm:$0xff]  ;;  %v721_v37 = vld [vmem:[#allocation7 + $0x2f0] sm:$0xff] }
  0xee   :  { %1048 = vmatpush.msrb.mxu1 %v772_v51  ;;  %1089 = vmatpush.msrb.mxu3 %v896_v52  ;;  %v880_v7 = vld [vmem:[#allocation7 + $0xce8] sm:$0xff]  ;;  %v845_v38 = vld [vmem:[#allocation7 + $0xab0] sm:$0xff] }
  0xef   :  { %1030 = vmatpush.msrb.mxu0 %v700_v53  ;;  %1071 = vmatpush.msrb.mxu2 %v824_v54  ;;  %v684_v61 = vld [vmem:[#allocation7 + $0xa8] sm:$0xff]  ;;  %v789_v39 = vld [vmem:[#allocation7 + $0x730] sm:$0xff] }
  0xf0   :  { %1049 = vmatpush.msrb.mxu1 %v768_v55  ;;  %1090 = vmatpush.msrb.mxu3 %v892_v56  ;;  %v808_v9 = vld [vmem:[#allocation7 + $0x868] sm:$0xff]  ;;  %v913_v40 = vld [vmem:[#allocation7 + $0xef0] sm:$0xff] }
  0xf1   :  { %1031 = vmatpush.msrb.mxu0 %v696_v57  ;;  %1072 = vmatpush.msrb.mxu2 %v820_v58  ;;  %v752_v10 = vld [vmem:[#allocation7 + $0x4e8] sm:$0xff]  ;;  %v717_v41 = vld [vmem:[#allocation7 + $0x2b0] sm:$0xff] }
  0xf2   :  { %1050 = vmatpush.msrb.mxu1 %v764_v59  ;;  %1091 = vmatpush.msrb.mxu3 %v888_v60  ;;  %v876_v11 = vld [vmem:[#allocation7 + $0xca8] sm:$0xff]  ;;  %v841_v42 = vld [vmem:[#allocation7 + $0xa70] sm:$0xff] }
  0xf3   :  { %1032 = vmatpush.msrb.mxu0 %v692_v62  ;;  %1073 = vmatpush.msrb.mxu2 %v816_v63  ;;  %v680_v3 = vld [vmem:[#allocation7 + $0x68] sm:$0xff]  ;;  %v785_v43 = vld [vmem:[#allocation7 + $0x6f0] sm:$0xff] }
  0xf4   :  { %1051 = vmatpush.msrb.mxu1 %v760_v0  ;;  %1092 = vmatpush.msrb.mxu3 %v884_v2  ;;  %v804_v12 = vld [vmem:[#allocation7 + $0x828] sm:$0xff]  ;;  %v909_v44 = vld [vmem:[#allocation7 + $0xeb0] sm:$0xff] }
  0xf5   :  { %1033 = vmatpush.msrb.mxu0 %v688_v4  ;;  %1074 = vmatpush.msrb.mxu2 %v812_v5  ;;  %v748_v13 = vld [vmem:[#allocation7 + $0x4a8] sm:$0xff]  ;;  %v713_v45 = vld [vmem:[#allocation7 + $0x270] sm:$0xff] }
  0xf6   :  { %1052 = vmatpush.msrb.mxu1 %v756_v6  ;;  %1093 = vmatpush.msrb.mxu3 %v880_v7  ;;  %v872_v14 = vld [vmem:[#allocation7 + $0xc68] sm:$0xff]  ;;  %v837_v46 = vld [vmem:[#allocation7 + $0xa30] sm:$0xff] }
  0xf7   :  { %1034 = vmatpush.msrb.mxu0 %v684_v61  ;;  %1075 = vmatpush.msrb.mxu2 %v808_v9  ;;  %v676_v16 = vld [vmem:[#allocation7 + $0x28] sm:$0xff]  ;;  %v781_v47 = vld [vmem:[#allocation7 + $0x6b0] sm:$0xff] }
  0xf8   :  { %1053 = vmatpush.msrb.mxu1 %v752_v10  ;;  %1094 = vmatpush.msrb.mxu3 %v876_v11  ;;  %v744_v18 = vld [vmem:[#allocation7 + $0x468] sm:$0xff]  ;;  %v905_v48 = vld [vmem:[#allocation7 + $0xe70] sm:$0xff] }
  0xf9   :  { %1035 = vmatpush.msrb.mxu0 %v680_v3  ;;  %1076 = vmatpush.msrb.mxu2 %v804_v12  ;;  %v868_v19 = vld [vmem:[#allocation7 + $0xc28] sm:$0xff]  ;;  %v709_v49 = vld [vmem:[#allocation7 + $0x230] sm:$0xff] }
  0xfa   :  { %1054 = vmatpush.msrb.mxu1 %v748_v13  ;;  %1095 = vmatpush.msrb.mxu3 %v872_v14  ;;  %v740_v24 = vld [vmem:[#allocation7 + $0x428] sm:$0xff]  ;;  %v833_v50 = vld [vmem:[#allocation7 + $0x9f0] sm:$0xff] }
  0xfb   :  { %1077 = vmatmul.f32.vlgmr.msrb.gmra.mxu2 %v1700_v1  ;;  %1036 = vmatpush.msrb.mxu0 %v676_v16  ;;  %v777_v51 = vld [vmem:[#allocation7 + $0x670] sm:$0xff] }
  0xfc   :  { %1141 = vmatpush.msra.mxu2 %v865_v17  ;;  %1055 = vmatpush.msrb.mxu1 %v744_v18  ;;  %v901_v52 = vld [vmem:[#allocation7 + $0xe30] sm:$0xff] }
  0xfd   :  { %1096 = vmatpush.msrb.mxu3 %v868_v19  ;;  %1037 = vmatmul.f32.vlgmr.msrb.gmra.mxu0 %v1702_v15  ;;  %v705_v53 = vld [vmem:[#allocation7 + $0x1f0] sm:$0xff] }
  0xfe   :  { %1097 = vmatmul.f32.vlgmr.msrb.gmra.mxu3 %v1705_v8  ;;  %1101 = vmatpush.msra.mxu0 %v737_v20  ;;  %v829_v54 = vld [vmem:[#allocation7 + $0x9b0] sm:$0xff] }
  0xff   :  { %1142 = vmatpush.msra.mxu2 %v861_v22  ;;  %1161 = vmatpush.msra.mxu3 %v929_v23  ;;  %v773_v55 = vld [vmem:[#allocation7 + $0x630] sm:$0xff]  ;;  %v866_v22 = vld [vmem:[#allocation7 + $0xbf8] sm:$0xff] }
 0x100   :  { %1056 = vmatpush.msrb.mxu1 %v740_v24  ;;  %1102 = vmatpush.msra.mxu0 %v733_v25  ;;  %v897_v56 = vld [vmem:[#allocation7 + $0xdf0] sm:$0xff]  ;;  %v738_v25 = vld [vmem:[#allocation7 + $0x3f8] sm:$0xff] }
 0x101   :  { %1057 = vmatmul.f32.vlgmr.msrb.gmra.mxu1 %v1709_v21  ;;  %1143 = vmatpush.msra.mxu2 %v857_v26  ;;  %v701_v57 = vld [vmem:[#allocation7 + $0x1b0] sm:$0xff]  ;;  %v862_v26 = vld [vmem:[#allocation7 + $0xbb8] sm:$0xff] }
 0x102   :  { %1121 = vmatpush.msra.mxu1 %v801_v27  ;;  %1162 = vmatpush.msra.mxu3 %v925_v28  ;;  %v825_v58 = vld [vmem:[#allocation7 + $0x970] sm:$0xff]  ;;  %v930_v27 = vld [vmem:[#allocation7 + $0xff8] sm:$0xff] }
 0x103   :  { %1103 = vmatpush.msra.mxu0 %v729_v29  ;;  %1144 = vmatpush.msra.mxu2 %v853_v30  ;;  %v769_v59 = vld [vmem:[#allocation7 + $0x5f0] sm:$0xff]  ;;  %v734_v29 = vld [vmem:[#allocation7 + $0x3b8] sm:$0xff] }
 0x104   :  { %1122 = vmatpush.msra.mxu1 %v797_v31  ;;  %1163 = vmatpush.msra.mxu3 %v921_v32  ;;  %v893_v60 = vld [vmem:[#allocation7 + $0xdb0] sm:$0xff]  ;;  %v858_v30 = vld [vmem:[#allocation7 + $0xb78] sm:$0xff] }
 0x105   :  { %1104 = vmatpush.msra.mxu0 %v725_v33  ;;  %1145 = vmatpush.msra.mxu2 %v849_v34  ;;  %v697_v62 = vld [vmem:[#allocation7 + $0x170] sm:$0xff]  ;;  %v802_v31 = vld [vmem:[#allocation7 + $0x7f8] sm:$0xff] }
 0x106   :  { %1123 = vmatpush.msra.mxu1 %v793_v35  ;;  %1164 = vmatpush.msra.mxu3 %v917_v36  ;;  %v821_v63 = vld [vmem:[#allocation7 + $0x930] sm:$0xff]  ;;  %v926_v32 = vld [vmem:[#allocation7 + $0xfb8] sm:$0xff] }
 0x107   :  { %1105 = vmatpush.msra.mxu0 %v721_v37  ;;  %1146 = vmatpush.msra.mxu2 %v845_v38  ;;  %v765_v0 = vld [vmem:[#allocation7 + $0x5b0] sm:$0xff]  ;;  %v730_v33 = vld [vmem:[#allocation7 + $0x378] sm:$0xff]  ;;  %v1720_v37 = vpop.f32.mrf.mxu0 }
 0x108   :  { %1124 = vmatpush.msra.mxu1 %v789_v39  ;;  %1165 = vmatpush.msra.mxu3 %v913_v40  ;;  %v889_v2 = vld [vmem:[#allocation7 + $0xd70] sm:$0xff]  ;;  %v854_v34 = vld [vmem:[#allocation7 + $0xb38] sm:$0xff] }
 0x109   :  { %1106 = vmatpush.msra.mxu0 %v717_v41  ;;  %1147 = vmatpush.msra.mxu2 %v841_v42  ;;  %v693_v4 = vld [vmem:[#allocation7 + $0x130] sm:$0xff]  ;;  %v798_v35 = vld [vmem:[#allocation7 + $0x7b8] sm:$0xff] }
 0x10a   :  { %1125 = vmatpush.msra.mxu1 %v785_v43  ;;  %1166 = vmatpush.msra.mxu3 %v909_v44  ;;  %v817_v5 = vld [vmem:[#allocation7 + $0x8f0] sm:$0xff]  ;;  %v922_v36 = vld [vmem:[#allocation7 + $0xf78] sm:$0xff] }
 0x10b   :  { %1107 = vmatpush.msra.mxu0 %v713_v45  ;;  %1148 = vmatpush.msra.mxu2 %v837_v46  ;;  %v761_v6 = vld [vmem:[#allocation7 + $0x570] sm:$0xff]  ;;  %v726_v38 = vld [vmem:[#allocation7 + $0x338] sm:$0xff]  ;;  %v1722_v46 = vpop.f32.mrf.mxu1 }
 0x10c   :  { %1126 = vmatpush.msra.mxu1 %v781_v47  ;;  %1167 = vmatpush.msra.mxu3 %v905_v48  ;;  %v885_v7 = vld [vmem:[#allocation7 + $0xd30] sm:$0xff]  ;;  %v850_v39 = vld [vmem:[#allocation7 + $0xaf8] sm:$0xff]  ;;  %v1724_v47 = vpop.f32.mrf.mxu2 }
 0x10d   :  { %1108 = vmatpush.msra.mxu0 %v709_v49  ;;  %1149 = vmatpush.msra.mxu2 %v833_v50  ;;  %v689_v61 = vld [vmem:[#allocation7 + $0xf0] sm:$0xff]  ;;  %v794_v40 = vld [vmem:[#allocation7 + $0x778] sm:$0xff] }
 0x10e   :  { %1127 = vmatpush.msra.mxu1 %v777_v51  ;;  %1168 = vmatpush.msra.mxu3 %v901_v52  ;;  %v813_v9 = vld [vmem:[#allocation7 + $0x8b0] sm:$0xff]  ;;  %v918_v41 = vld [vmem:[#allocation7 + $0xf38] sm:$0xff] }
 0x10f   :  { %1109 = vmatpush.msra.mxu0 %v705_v53  ;;  %1150 = vmatpush.msra.mxu2 %v829_v54  ;;  %v757_v10 = vld [vmem:[#allocation7 + $0x530] sm:$0xff]  ;;  %v722_v42 = vld [vmem:[#allocation7 + $0x2f8] sm:$0xff]  ;;  %v1726_v54 = vpop.f32.mrf.mxu3 }
 0x110   :  { %1128 = vmatpush.msra.mxu1 %v773_v55  ;;  %1169 = vmatpush.msra.mxu3 %v897_v56  ;;  %v881_v11 = vld [vmem:[#allocation7 + $0xcf0] sm:$0xff]  ;;  %v846_v43 = vld [vmem:[#allocation7 + $0xab8] sm:$0xff] }
 0x111   :  { %1110 = vmatpush.msra.mxu0 %v701_v57  ;;  %1151 = vmatpush.msra.mxu2 %v825_v58  ;;  %v685_v3 = vld [vmem:[#allocation7 + $0xb0] sm:$0xff]  ;;  %v790_v44 = vld [vmem:[#allocation7 + $0x738] sm:$0xff] }
 0x112   :  { %1129 = vmatpush.msra.mxu1 %v769_v59  ;;  %1170 = vmatpush.msra.mxu3 %v893_v60  ;;  %v809_v12 = vld [vmem:[#allocation7 + $0x870] sm:$0xff]  ;;  %v914_v45 = vld [vmem:[#allocation7 + $0xef8] sm:$0xff]  ;;  %v1728_v57 = vpop.f32.mrf.mxu0 }
 0x113   :  { %1111 = vmatpush.msra.mxu0 %v697_v62  ;;  %1152 = vmatpush.msra.mxu2 %v821_v63  ;;  %v753_v13 = vld [vmem:[#allocation7 + $0x4f0] sm:$0xff]  ;;  %v718_v48 = vld [vmem:[#allocation7 + $0x2b8] sm:$0xff] }
 0x114   :  { %1130 = vmatpush.msra.mxu1 %v765_v0  ;;  %1171 = vmatpush.msra.mxu3 %v889_v2  ;;  %v877_v14 = vld [vmem:[#allocation7 + $0xcb0] sm:$0xff]  ;;  %v842_v49 = vld [vmem:[#allocation7 + $0xa78] sm:$0xff] }
 0x115   :  { %1112 = vmatpush.msra.mxu0 %v693_v4  ;;  %1153 = vmatpush.msra.mxu2 %v817_v5  ;;  %v681_v16 = vld [vmem:[#allocation7 + $0x70] sm:$0xff]  ;;  %v786_v50 = vld [vmem:[#allocation7 + $0x6f8] sm:$0xff]  ;;  %v1730_v5 = vld [vmem:[#allocation8] sm:$0xf] }
 0x116   :  { %1131 = vmatpush.msra.mxu1 %v761_v6  ;;  %1172 = vmatpush.msra.mxu3 %v885_v7  ;;  %v805_v17 = vld [vmem:[#allocation7 + $0x830] sm:$0xff]  ;;  %v910_v51 = vld [vmem:[#allocation7 + $0xeb8] sm:$0xff]  ;;  %v1732_v6 = vpop.f32.mrf.mxu1  ;;  %v1734_v7 = vpop.f32.mrf.mxu2 }
 0x117   :  { %1113 = vmatpush.msra.mxu0 %v689_v61  ;;  %1154 = vmatpush.msra.mxu2 %v813_v9  ;;  %v749_v18 = vld [vmem:[#allocation7 + $0x4b0] sm:$0xff]  ;;  %v714_v52 = vld [vmem:[#allocation7 + $0x278] sm:$0xff] }
 0x118   :  { %1132 = vmatpush.msra.mxu1 %v757_v10  ;;  %1173 = vmatpush.msra.mxu3 %v881_v11  ;;  %v873_v19 = vld [vmem:[#allocation7 + $0xc70] sm:$0xff]  ;;  %v838_v53 = vld [vmem:[#allocation7 + $0xa38] sm:$0xff] }
 0x119   :  { %1114 = vmatpush.msra.mxu0 %v685_v3  ;;  %1155 = vmatpush.msra.mxu2 %v809_v12  ;;  %v677_v20 = vld [vmem:[#allocation7 + $0x30] sm:$0xff]  ;;  %v782_v55 = vld [vmem:[#allocation7 + $0x6b8] sm:$0xff]  ;;  %v349_v3 = vperm.slane %v1730_v5, 2 }
 0x11a   :  { %1133 = vmatpush.msra.mxu1 %v753_v13  ;;  %1174 = vmatpush.msra.mxu3 %v877_v14  ;;  %v745_v23 = vld [vmem:[#allocation7 + $0x470] sm:$0xff]  ;;  %v906_v56 = vld [vmem:[#allocation7 + $0xe78] sm:$0xff]  ;;  %v1737_v14 = vpop.f32.mrf.mxu3 }
 0x11b   :  { %1115 = vmatpush.msra.mxu0 %v681_v16  ;;  %1156 = vmatpush.msra.mxu2 %v805_v17  ;;  %v869_v24 = vld [vmem:[#allocation7 + $0xc30] sm:$0xff]  ;;  %v710_v58 = vld [vmem:[#allocation7 + $0x238] sm:$0xff] }
 0x11c   :  { %1134 = vmatpush.msra.mxu1 %v749_v18  ;;  %1175 = vmatpush.msra.mxu3 %v873_v19  ;;  %v741_v28 = vld [vmem:[#allocation7 + $0x430] sm:$0xff]  ;;  %v834_v59 = vld [vmem:[#allocation7 + $0x9f8] sm:$0xff] }
 0x11d   :  { %1157 = vmatmul.f32.vlgmr.msra.gmra.mxu2 %v1700_v1  ;;  %1116 = vmatpush.msra.mxu0 %v677_v20  ;;  %v778_v60 = vld [vmem:[#allocation7 + $0x678] sm:$0xff] }
 0x11e   :  { %1221 = vmatpush.msrb.mxu2 %v866_v22  ;;  %1135 = vmatpush.msra.mxu1 %v745_v23  ;;  %v902_v62 = vld [vmem:[#allocation7 + $0xe38] sm:$0xff] }
 0x11f   :  { %1176 = vmatpush.msra.mxu3 %v869_v24  ;;  %1117 = vmatmul.f32.vlgmr.msra.gmra.mxu0 %v1702_v15  ;;  %v706_v63 = vld [vmem:[#allocation7 + $0x1f8] sm:$0xff] }
 0x120   :  { %1177 = vmatmul.f32.vlgmr.msra.gmra.mxu3 %v1705_v8  ;;  %1181 = vmatpush.msrb.mxu0 %v738_v25  ;;  %v830_v0 = vld [vmem:[#allocation7 + $0x9b8] sm:$0xff] }
 0x121   :  { %1222 = vmatpush.msrb.mxu2 %v862_v26  ;;  %1241 = vmatpush.msrb.mxu3 %v930_v27  ;;  %v774_v2 = vld [vmem:[#allocation7 + $0x638] sm:$0xff] }
 0x122   :  { %1136 = vmatpush.msra.mxu1 %v741_v28  ;;  %1182 = vmatpush.msrb.mxu0 %v734_v29  ;;  %v898_v4 = vld [vmem:[#allocation7 + $0xdf8] sm:$0xff] }
 0x123   :  { %1137 = vmatmul.f32.vlgmr.msra.gmra.mxu1 %v1709_v21  ;;  %1223 = vmatpush.msrb.mxu2 %v858_v30  ;;  %v702_v61 = vld [vmem:[#allocation7 + $0x1b8] sm:$0xff] }
 0x124   :  { %1201 = vmatpush.msrb.mxu1 %v802_v31  ;;  %1242 = vmatpush.msrb.mxu3 %v926_v32  ;;  %v826_v9 = vld [vmem:[#allocation7 + $0x978] sm:$0xff] }
 0x125   :  { %1183 = vmatpush.msrb.mxu0 %v730_v33  ;;  %1224 = vmatpush.msrb.mxu2 %v854_v34  ;;  %v770_v10 = vld [vmem:[#allocation7 + $0x5f8] sm:$0xff] }
 0x126   :  { %1202 = vmatpush.msrb.mxu1 %v798_v35  ;;  %1243 = vmatpush.msrb.mxu3 %v922_v36  ;;  %v894_v11 = vld [vmem:[#allocation7 + $0xdb8] sm:$0xff] }
 0x127   :  { %1184 = vmatpush.msrb.mxu0 %v726_v38  ;;  %1225 = vmatpush.msrb.mxu2 %v850_v39  ;;  %v698_v12 = vld [vmem:[#allocation7 + $0x178] sm:$0xff] }
 0x128   :  { %1203 = vmatpush.msrb.mxu1 %v794_v40  ;;  %1244 = vmatpush.msrb.mxu3 %v918_v41  ;;  %v822_v13 = vld [vmem:[#allocation7 + $0x938] sm:$0xff] }
 0x129   :  { %1185 = vmatpush.msrb.mxu0 %v722_v42  ;;  %1226 = vmatpush.msrb.mxu2 %v846_v43  ;;  %v766_v16 = vld [vmem:[#allocation7 + $0x5b8] sm:$0xff] }
 0x12a   :  { %1204 = vmatpush.msrb.mxu1 %v790_v44  ;;  %1245 = vmatpush.msrb.mxu3 %v914_v45  ;;  %v890_v17 = vld [vmem:[#allocation7 + $0xd78] sm:$0xff] }
 0x12b   :  { %1186 = vmatpush.msrb.mxu0 %v718_v48  ;;  %1227 = vmatpush.msrb.mxu2 %v842_v49  ;;  %v694_v18 = vld [vmem:[#allocation7 + $0x138] sm:$0xff] }
 0x12c   :  { %1205 = vmatpush.msrb.mxu1 %v786_v50  ;;  %1246 = vmatpush.msrb.mxu3 %v910_v51  ;;  %v818_v19 = vld [vmem:[#allocation7 + $0x8f8] sm:$0xff]  ;;  %v350_v50 = vperm.slane %v1730_v5, 3 }
 0x12d   :  { %1187 = vmatpush.msrb.mxu0 %v714_v52  ;;  %1228 = vmatpush.msrb.mxu2 %v838_v53  ;;  %v762_v22 = vld [vmem:[#allocation7 + $0x578] sm:$0xff] }
 0x12e   :  { %1206 = vmatpush.msrb.mxu1 %v782_v55  ;;  %1247 = vmatpush.msrb.mxu3 %v906_v56  ;;  %v886_v23 = vld [vmem:[#allocation7 + $0xd38] sm:$0xff] }
 0x12f   :  { %1188 = vmatpush.msrb.mxu0 %v710_v58  ;;  %1229 = vmatpush.msrb.mxu2 %v834_v59  ;;  %v690_v25 = vld [vmem:[#allocation7 + $0xf8] sm:$0xff]  ;;  %v931_v58 = vld [vmem:[#allocation8 + $0x4] sm:$0xf]  ;;  %v347_v59 = vperm.slane %v1730_v5, 0 }
 0x130   :  { %1207 = vmatpush.msrb.mxu1 %v778_v60  ;;  %1248 = vmatpush.msrb.mxu3 %v902_v62  ;;  %v814_v26 = vld [vmem:[#allocation7 + $0x8b8] sm:$0xff] }
 0x131   :  { %1189 = vmatpush.msrb.mxu0 %v706_v63  ;;  %1230 = vmatpush.msrb.mxu2 %v830_v0  ;;  %v758_v27 = vld [vmem:[#allocation7 + $0x538] sm:$0xff]  ;;  %v933_v63 = vperm.slane %v931_v58, 0 }
 0x132   :  { %1208 = vmatpush.msrb.mxu1 %v774_v2  ;;  %1249 = vmatpush.msrb.mxu3 %v898_v4  ;;  %v882_v28 = vld [vmem:[#allocation7 + $0xcf8] sm:$0xff]  ;;  %v373_v2 = vadd.f32 %v1720_v37, %v347_v59  ;;  %v348_v37 = vperm.slane %v1730_v5, 1  ;;  %v935_v5 = vperm.slane %v931_v58, 2 }
 0x133   :  { %1190 = vmatpush.msrb.mxu0 %v702_v61  ;;  %1231 = vmatpush.msrb.mxu2 %v826_v9  ;;  %v686_v29 = vld [vmem:[#allocation7 + $0xb8] sm:$0xff] }
 0x134   :  { %1209 = vmatpush.msrb.mxu1 %v770_v10  ;;  %1250 = vmatpush.msrb.mxu3 %v894_v11  ;;  %v532_v20 = vpop.f32.mrf.mxu0  ;;  %v810_v30 = vld [vmem:[#allocation7 + $0x878] sm:$0xff]  ;;  %v393_v9 = vadd.f32 %v1722_v46, %v373_v2 }
 0x135   :  { %1191 = vmatpush.msrb.mxu0 %v698_v12  ;;  %1232 = vmatpush.msrb.mxu2 %v822_v13  ;;  %v533_v24 = vadd.f32 %v532_v20, %v349_v3  ;;  %v754_v33 = vld [vmem:[#allocation7 + $0x4f8] sm:$0xff]  ;;  %v453_v20 = vadd.f32 %v1728_v57, %v348_v37 }
 0x136   :  { %1210 = vmatpush.msrb.mxu1 %v766_v16  ;;  %1251 = vmatpush.msrb.mxu3 %v890_v17  ;;  %v878_v34 = vld [vmem:[#allocation7 + $0xcb8] sm:$0xff]  ;;  %v413_v16 = vadd.f32 %v1724_v47, %v393_v9 }
 0x137   :  { %1192 = vmatpush.msrb.mxu0 %v694_v18  ;;  %1233 = vmatpush.msrb.mxu2 %v818_v19  ;;  %v682_v36 = vld [vmem:[#allocation7 + $0x78] sm:$0xff]  ;;  %v934_v19 = vperm.slane %v931_v58, 1 }
 0x138   :  { %1211 = vmatpush.msrb.mxu1 %v762_v22  ;;  %1252 = vmatpush.msrb.mxu3 %v886_v23  ;;  %v552_v31 = vpop.f32.mrf.mxu1  ;;  %v572_v32 = vpop.f32.mrf.mxu2  ;;  %v806_v38 = vld [vmem:[#allocation7 + $0x838] sm:$0xff]  ;;  %v433_v18 = vadd.f32 %v1726_v54, %v413_v16  ;;  %v473_v23 = vadd.f32 %v1732_v6, %v453_v20 }
 0x139   :  { %1193 = vmatpush.msrb.mxu0 %v690_v25  ;;  %1234 = vmatpush.msrb.mxu2 %v814_v26  ;;  %v553_v35 = vadd.f32 %v552_v31, %v533_v24  ;;  %v750_v39 = vld [vmem:[#allocation7 + $0x4b8] sm:$0xff] }
 0x13a   :  { %1212 = vmatpush.msrb.mxu1 %v758_v27  ;;  %1253 = vmatpush.msrb.mxu3 %v882_v28  ;;  %v874_v40 = vld [vmem:[#allocation7 + $0xc78] sm:$0xff]  ;;  %v493_v28 = vadd.f32 %v1734_v7, %v473_v23  ;;  %v936_v7 = vperm.slane %v931_v58, 3 }
 0x13b   :  { %1194 = vmatpush.msrb.mxu0 %v686_v29  ;;  %1235 = vmatpush.msrb.mxu2 %v810_v30  ;;  %v573_v41 = vadd.f32 %v572_v32, %v553_v35  ;;  %v592_v42 = vpop.f32.mrf.mxu3  ;;  %v678_v43 = vld [vmem:[#allocation7 + $0x38] sm:$0xff] }
 0x13c   :  { %1213 = vmatpush.msrb.mxu1 %v754_v33  ;;  %1254 = vmatpush.msrb.mxu3 %v878_v34  ;;  %v746_v44 = vld [vmem:[#allocation7 + $0x478] sm:$0xff] }
 0x13d   :  { %1195 = vmatpush.msrb.mxu0 %v682_v36  ;;  %1236 = vmatpush.msrb.mxu2 %v806_v38  ;;  %v870_v45 = vld [vmem:[#allocation7 + $0xc38] sm:$0xff]  ;;  %v1739_v48 = vadd.f32 %v592_v42, %v573_v41 }
 0x13e   :  { %1214 = vmatpush.msrb.mxu1 %v750_v39  ;;  %1255 = vmatpush.msrb.mxu3 %v874_v40  ;;  %v742_v49 = vld [vmem:[#allocation7 + $0x438] sm:$0xff] }
 0x13f   :  { %1237 = vmatmul.f32.vlgmr.msrb.gmra.mxu2 %v1700_v1  ;;  %1196 = vmatpush.msrb.mxu0 %v678_v43 }
 0x140   :  { %1215 = vmatpush.msrb.mxu1 %v746_v44  ;;  %1256 = vmatpush.msrb.mxu3 %v870_v45 }
 0x141   :  { %1197 = vmatmul.f32.vlgmr.msrb.gmra.mxu0 %v1702_v15  ;;  %1257 = vmatmul.f32.vlgmr.msrb.gmra.mxu3 %v1705_v8 }
 0x142   :  { %1216 = vmatpush.msrb.mxu1 %v742_v49 }
 0x143   :  { %1217 = vmatmul.f32.vlgmr.msrb.gmra.mxu1 %v1709_v21 }
 0x14e   :  { %v612_v51 = vpop.f32.mrf.mxu0 }
 0x14f   :  { %v613_v52 = vadd.f32 %v612_v51, %v350_v50 }
 0x151   :  { %v632_v53 = vpop.f32.mrf.mxu1 }
 0x152   :  { %v633_v55 = vadd.f32 %v632_v53, %v613_v52  ;;  %v652_v56 = vpop.f32.mrf.mxu2 }
 0x154   :  { %v653_v60 = vadd.f32 %v652_v56, %v633_v55 }
 0x155   :  { %v672_v62 = vpop.f32.mrf.mxu3 }
 0x156   :  { %v673_v0 = vadd.f32 %v672_v62, %v653_v60 }
 0x158   :  { %v958_v4 = vpop.f32.mrf.mxu0 }
 0x159   :  { %v959_v61 = vadd.f32 %v958_v4, %v933_v63 }
 0x15c   :  { %v978_v10 = vpop.f32.mrf.mxu1  ;;  %v998_v11 = vpop.f32.mrf.mxu2 }
 0x15d   :  { %v979_v3 = vadd.f32 %v978_v10, %v959_v61 }
 0x15f   :  { %v999_v12 = vadd.f32 %v998_v11, %v979_v3  ;;  %v1018_v13 = vpop.f32.mrf.mxu3 }
 0x161   :  { %v1019_v17 = vadd.f32 %v1018_v13, %v999_v12  ;;  %v1465_v12 = vlaneseq }
 0x163   :  { %1276 = vmatpush.xpose.msra.mxu0 %v1019_v17  ;;  %vm1467_vm9 = vcmp.lt.s32.totalorder %v1465_v12, 512 }
 0x166   :  { %1277 = vmatmul.f32.vlgmr.msra.gmra.mxu0 %v433_v18 }
 0x167   :  { %1386 = vmatpush.msrb.mxu0 %v1702_v15  ;;  %v513_v15 = vadd.f32 %v1737_v14, %v493_v28 }
 0x17a   :  { %v1038_v46 = vpop.f32.mrf.mxu0 }
 0x17b   :  { %v1039_v22 = vadd.f32 %v1038_v46, %v934_v19 }
 0x17e   :  { %v1058_v24 = vpop.f32.mrf.mxu1  ;;  %v1078_v25 = vpop.f32.mrf.mxu2 }
 0x17f   :  { %v1059_v26 = vadd.f32 %v1058_v24, %v1039_v22 }
 0x181   :  { %v1079_v47 = vadd.f32 %v1078_v25, %v1059_v26  ;;  %v1098_v27 = vpop.f32.mrf.mxu3 }
 0x183   :  { %v1099_v54 = vadd.f32 %v1098_v27, %v1079_v47 }
 0x185   :  { %1296 = vmatpush.xpose.msra.mxu1 %v1099_v54 }
 0x188   :  { %1297 = vmatmul.f32.vlgmr.msra.gmra.mxu1 %v513_v15 }
 0x189   :  { %1406 = vmatpush.msrb.mxu1 %v1709_v21 }
 0x19c   :  { %v1118_v57 = vpop.f32.mrf.mxu0 }
 0x19d   :  { %v1119_v29 = vadd.f32 %v1118_v57, %v935_v5 }
 0x1a0   :  { %v1138_v30 = vpop.f32.mrf.mxu1  ;;  %v1158_v31 = vpop.f32.mrf.mxu2 }
 0x1a1   :  { %v1139_v6 = vadd.f32 %v1138_v30, %v1119_v29 }
 0x1a3   :  { %v1159_v32 = vadd.f32 %v1158_v31, %v1139_v6  ;;  %v1178_v33 = vpop.f32.mrf.mxu3 }
 0x1a5   :  { %v1179_v34 = vadd.f32 %v1178_v33, %v1159_v32 }
 0x1a7   :  { %1316 = vmatpush.xpose.msra.mxu2 %v1179_v34 }
 0x1aa   :  { %1317 = vmatmul.f32.vlgmr.msra.gmra.mxu2 %v1739_v48 }
 0x1ab   :  { %1426 = vmatpush.msrb.mxu2 %v1700_v1 }
 0x1be   :  { %v1198_v35 = vpop.f32.mrf.mxu0 }
 0x1bf   :  { %v1199_v14 = vadd.f32 %v1198_v35, %v936_v7 }
 0x1c0   :  { %v1218_v36 = vpop.f32.mrf.mxu1 }
 0x1c1   :  { %v1219_v21 = vadd.f32 %v1218_v36, %v1199_v14 }
 0x1c2   :  { %v1238_v38 = vpop.f32.mrf.mxu2 }
 0x1c3   :  { %v1239_v39 = vadd.f32 %v1238_v38, %v1219_v21 }
 0x1c4   :  { %v1258_v40 = vpop.f32.mrf.mxu3 }
 0x1c5   :  { %v1259_v41 = vadd.f32 %v1258_v40, %v1239_v39 }
 0x1c7   :  { %1336 = vmatpush.xpose.msra.mxu3 %v1259_v41 }
 0x1ca   :  { %1337 = vmatmul.f32.vlgmr.msra.gmra.mxu3 %v673_v0 }
 0x1cb   :  { %1446 = vmatpush.msrb.mxu3 %v1705_v8 }
 0x1e3   :  { %v1278_v43 = vpop.f32.mrf.mxu0 }
 0x205   :  { %v1298_v42 = vpop.f32.mrf.mxu1 }
 0x206   :  { %v1299_v45 = vadd.f32 %v1298_v42, %v1278_v43 }
 0x22d   :  { %v1318_v44 = vpop.f32.mrf.mxu2 }
 0x22e   :  { %v1319_v1 = vadd.f32 %v1318_v44, %v1299_v45 }
 0x24d   :  { %v1338_v49 = vpop.f32.mrf.mxu3 }
 0x24e   :  { %v1339_v48 = vadd.f32 %v1338_v49, %v1319_v1 }
 0x250   :  { %v1341_v50 = vmul.f32 0.044194173, %v1339_v48 }
 0x252   :  { %v1343_v51 = vsel %vm1342_vm0, %v1341_v50, -inf }
 0x253   :  { %1344 = vmax.xlane.f32.xlu0 %v1343_v51 }
 0x2c6   :  { %v1345_v52 = vpop.xlane.xlu0 %1344 }
 0x2c7   :  { %v1346_v53 = vsub.f32 %v1341_v50, %v1345_v52 }
 0x2c9   :  { %v1347_v55 = vmul.f32 1.442695, %v1346_v53 }
 0x2cb   :  { %1500 = vpow2.f32 %v1347_v55 }
 0x2d1   :  { %v1501_v56 = vpop.eup %1500 }
 0x2d2   :  { %v1349_v58 = vsel %vm1342_vm0, %v1501_v56, 0.0 }
 0x2d3   :  { %1350 = vadd.xlane.f32.xlu0 %v1349_v58 }
 0x346   :  { %v1351_v8 = vpop.xlane.xlu0 %1350 }
 0x347   :  { %1502 = vrcp.f32 %v1351_v8  ;;  %v1363_v63 = vand.u32 2147483648, %v1351_v8  ;;  %v1361_v2 = vand.u32 2147483647, %v1351_v8  ;;  %vm1357_vm2 = vweird.f32 %v1351_v8 }
 0x349   :  { %v1364_v61 = vor.u32 1.1754944e-38, %v1363_v63  ;;  %vm1362_vm4 = vcmp.eq.f32.partialorder %v1361_v2, 8.507059e+37 }
 0x34d   :  { %v1503_v59 = vpop.eup %1502 }
 0x34e   :  { %v1353_v60 = vmul.f32 %v1503_v59, %v1351_v8  ;;  %vm1358_vm1 = vweird.f32 %v1503_v59 }
 0x34f   :  { %vm1359_vm3 = vmor %vm1357_vm2, %vm1358_vm1 }
 0x350   :  { %v1354_v62 = vsub.f32 1.0, %v1353_v60 }
 0x352   :  { %v1355_v0 = vmul.f32 %v1503_v59, %v1354_v62 }
 0x354   :  { %v1356_v4 = vadd.f32 %v1503_v59, %v1355_v0 }
 0x356   :  { %v1360_v9 = vsel %vm1359_vm3, %v1503_v59, %v1356_v4 }
 0x357   :  { %v1365_v10 = vsel %vm1362_vm4, %v1364_v61, %v1360_v9 }
 0x358   :  { %v1366_v11 = vmul.f32 %v1501_v56, %v1365_v10 }
 0x35a   :  { %1489 = vmatmul.msk.f32.vlgmr.msrb.gmra.mxu0 %vm1367_vm5, %v1366_v11  ;;  %1490 = vmatmul.msk.f32.vlgmr.msrb.gmra.mxu1 %vm1367_vm5, %v1366_v11 }
 0x35b   :  { %1491 = vmatmul.msk.f32.vlgmr.msrb.gmra.mxu2 %vm1367_vm5, %v1366_v11  ;;  %1492 = vmatmul.msk.f32.vlgmr.msrb.gmra.mxu3 %vm1367_vm5, %v1366_v11 }
 0x3d7   :  { %v1408_v3 = vpop.f32.mrf.mxu1  ;;  %v1388_v19 = vpop.f32.mrf.mxu0 }
 0x3d8   :  { %v1455_v13 = vrot.slane %v1408_v3, 7 }
 0x3da   :  { %v1459_v20 = vsel %vm1458_vm6, %v1388_v19, %v1455_v13 }
 0x3de   :  { %v1428_v16 = vpop.f32.mrf.mxu2  ;;  %v1448_v17 = vpop.f32.mrf.mxu3 }
 0x3df   :  { %v1456_v18 = vrot.slane %v1428_v16, 6  ;;  %v1457_v37 = vrot.slane %v1448_v17, 5 }
 0x3e1   :  { %v1461_v46 = vsel %vm1460_vm7, %v1456_v18, %v1457_v37 }
 0x3e2   :  { %v1463_v22 = vsel %vm1462_vm8, %v1459_v20, %v1461_v46 }
 0x3e3   :  { %1469 = vst.msk [vmem:[#allocation10] sm:$0xf] %vm1467_vm9, %v1463_v22 }
 0x3e4   :  { %1480 = dma.vmem_to_hbm [thread:$0]  %s1476_s3, 64, %s1478_s11, [#allocation4]  }
 0x3e5   :  { %1630 = dma.done.wait [#allocation4], 64  }
 0x3e6   :  { %1631 = vsyncadd [#allocation4], 4294967232 }
 0x3e7   :  { %1485 = vsyncpa [#allocation3], 1 }
 0x3e8   :  { %1486 = vsyncpa [#allocation6], 1 }
 0x3e9   :  { %1487 = vsyncpa [#allocation9], 1 }
 0x3ea   :  { %1488 = vsyncpa [#allocation4], 1 }

</bundles_post_ra>
